<compile_context>
chip_gen: v7x
topology: tpu7x:2x2x1
jax: 0.10.0
libtpu: 0.0.40
codegen_flags: <defaults>
</compile_context>

<pallas_src>
import functools

import jax
import jax.numpy as jnp
from jax import lax
from jax.experimental import pallas as pl
from jax.experimental.pallas import tpu as pltpu

# ----------------------------- problem sizes --------------------------------
STATE_DIM = 16
GOAL_DIM = 8
ACTION_DIM = 8
NUM_PRIMITIVES = 3
H = 64          # hidden_layer_sizes = [64, 64]   (big_model=False)
VH = 64         # value_hidden_layer_sizes = [64, 64]
PH = 64         # primitive mlp_extractor hidden size
BATCH = 16
TB = 8          # row tile (grid over batch / rollout rows)
LEARN_LOG_STD = True

FEAT_DIM = STATE_DIM + GOAL_DIM          # 24
ENC_OUT = 3 * H                          # 192  (state-enc | goal-enc | value)
PRIM_OUT = NUM_PRIMITIVES * PH           # 192  (prim0 | prim1 | prim2)
L1_OUT = ENC_OUT + PRIM_OUT              # 384
MU_OUT = NUM_PRIMITIVES * ACTION_DIM     # 24
W3_OUT = 128                             # gate-hidden(64) | mu(24) | pad(40)
OUT_WIDTH = 128                          # lane-dense output slab
OUT_USED = VH + 2 * ACTION_DIM           # 80 (value | mean | scale)
MISC_ROWS = 16                           # biases + inv-sigma + g_w2^T


# ------------------------------- kernel -------------------------------------
def mcp_kernel(feat_ref, w1_ref, w2_ref, w3_ref, misc_ref, out_ref):
    relu = lambda x: jnp.maximum(x, 0.0)
    dot = functools.partial(jnp.dot, preferred_element_type=jnp.float32)

    feat = feat_ref[...]                               # [TB, 24]
    misc = misc_ref[...]                               # [16, 384]
    b1 = misc[0:1, :]                                  # [1, 384]
    b2 = misc[1:2, :]                                  # [1, 384]
    b3 = misc[2:3, :W3_OUT]                            # [1, 128]  gate-h | mu bias
    bg2 = misc[3:4, :NUM_PRIMITIVES]                   # [1, 3]
    inv_sig_blk = misc[4:4 + NUM_PRIMITIVES, :MU_OUT]  # [3, 24]  block exp(-log_std)
    wg2t = misc[8:8 + NUM_PRIMITIVES, :H]              # [3, 64]  g_w2 transposed

    # ---- fused layer 1: encoders + value-net + primitive first layers -------
    h1 = relu(dot(feat, w1_ref[...]) + b1)             # [TB, 384]

    # ---- fused layer 2: single block-diagonal [384, 384] ---------------------
    h2 = relu(dot(h1, w2_ref[...]) + b2)               # [TB, 384]

    # ---- fused layer 3: gate hidden + action heads in one [384, 128] dot -----
    h3 = dot(h2, w3_ref[...]) + b3                      # [TB, 128]
    gate_h = relu(h3[:, :H])                            # [TB, 64]
    mu_all = h3[:, H:H + MU_OUT]                        # [TB, 24]

    # ---- gate output: contract on the 64-dim against transposed g_w2 ---------
    logits = lax.dot_general(gate_h, wg2t, (((1,), (1,)), ((), ())),
                             preferred_element_type=jnp.float32)   # [TB, 3]
    weights = jax.nn.sigmoid(logits + bg2)

    # ---- MCP mixture (vectorized) --------------------------------------------
    # wos_flat[b, 8i+a] = weights[b, i] * exp(-log_std[i, a])
    wos_flat = dot(weights, inv_sig_blk)                 # [TB, 24]
    A = ACTION_DIM
    denom = wos_flat[:, 0:A] + wos_flat[:, A:2 * A] + wos_flat[:, 2 * A:3 * A]
    prod = wos_flat * mu_all
    unnorm = prod[:, 0:A] + prod[:, A:2 * A] + prod[:, 2 * A:3 * A]

    inv_denom = pl.reciprocal(denom, approx=False)       # one divide, reused
    mean = unnorm * inv_denom                            # [TB, 8]
    scale = inv_denom                                    # [TB, 8] scale_tril diag
    value = h2[:, 2 * H:2 * H + VH]                      # [TB, 64]

    # ---- lane-aligned output slab: value | mean | scale | pad ----------------
    bsz = feat.shape[0]
    out_ref[:, 0:VH] = value
    out_ref[:, VH:VH + ACTION_DIM] = mean
    out_ref[:, VH + ACTION_DIM:VH + 2 * ACTION_DIM] = scale
    out_ref[:, OUT_USED:] = jnp.zeros((bsz, OUT_WIDTH - OUT_USED), jnp.float32)


# ------------------------------ wrapper --------------------------------------
def mcp_forward(features, packed, learn_log_std=LEARN_LOG_STD, tb=TB):
    b = features.shape[0]
    assert b % tb == 0, "batch must be a multiple of the row tile"
    w1, w2, w3, misc = packed

    out = pl.pallas_call(
        mcp_kernel,
        out_shape=jax.ShapeDtypeStruct((b, OUT_WIDTH), jnp.float32),
        grid_spec=pltpu.PrefetchScalarGridSpec(
            num_scalar_prefetch=0,
            grid=(b // tb,),
            in_specs=[
                pl.BlockSpec((tb, FEAT_DIM), lambda i: (i, 0)),        # rows
                pl.BlockSpec((FEAT_DIM, L1_OUT), lambda i: (0, 0)),    # w1 resident
                pl.BlockSpec((L1_OUT, L1_OUT), lambda i: (0, 0)),      # w2 resident
                pl.BlockSpec((L1_OUT, W3_OUT), lambda i: (0, 0)),      # w3 resident
                pl.BlockSpec((MISC_ROWS, L1_OUT), lambda i: (0, 0)),   # misc resident
            ],
            out_specs=pl.BlockSpec((tb, OUT_WIDTH), lambda i: (i, 0)),
        ),
        compiler_params=pltpu.CompilerParams(
            dimension_semantics=("parallel",)),
    )(features, w1, w2, w3, misc)

    value = out[:, :VH]
    mean = out[:, VH:VH + ACTION_DIM]
    scale = out[:, VH + ACTION_DIM:VH + 2 * ACTION_DIM]
    if learn_log_std:
        return mean, value
    return (mean, scale), value


# --------------------------- raw parameter init -------------------------------
def _linear(key, fan_in, fan_out):
    kw, kb = jax.random.split(key)
    bound = 1.0 / jnp.sqrt(fan_in)
    w = jax.random.uniform(kw, (fan_in, fan_out), jnp.float32, -bound, bound)
    b = jax.random.uniform(kb, (1, fan_out), jnp.float32, -bound, bound)
    return w, b


def init_params(key):
    keys = jax.random.split(key, 16)
    se_w1, se_b1 = _linear(keys[0], STATE_DIM, H)
    se_w2, se_b2 = _linear(keys[1], H, H)
    ge_w1, ge_b1 = _linear(keys[2], GOAL_DIM, H)
    ge_w2, ge_b2 = _linear(keys[3], H, H)
    g_w1, g_b1 = _linear(keys[4], 2 * H, H)
    g_w2, g_b2 = _linear(keys[5], H, NUM_PRIMITIVES)

    p_w1, p_b1, p_w2, p_b2, pa_w, pa_b, p_logstd = [], [], [], [], [], [], []
    pkeys = jax.random.split(keys[6], NUM_PRIMITIVES)
    for i in range(NUM_PRIMITIVES):
        k = jax.random.split(pkeys[i], 4)
        w1, b1 = _linear(k[0], STATE_DIM, PH)
        w2, b2 = _linear(k[1], PH, PH)
        wa, ba = _linear(k[2], PH, ACTION_DIM)
        ls = jax.random.uniform(k[3], (1, ACTION_DIM), jnp.float32, -0.5, 0.5)
        p_w1.append(w1); p_b1.append(b1); p_w2.append(w2); p_b2.append(b2)
        pa_w.append(wa); pa_b.append(ba); p_logstd.append(ls)
    p_w1 = jnp.stack(p_w1); p_b1 = jnp.stack(p_b1)
    p_w2 = jnp.stack(p_w2); p_b2 = jnp.stack(p_b2)
    pa_w = jnp.stack(pa_w); pa_b = jnp.stack(pa_b)
    p_logstd = jnp.stack(p_logstd)

    v_w1, v_b1 = _linear(keys[7], FEAT_DIM, VH)
    v_w2, v_b2 = _linear(keys[8], VH, VH)

    return (se_w1, se_b1, se_w2, se_b2,
            ge_w1, ge_b1, ge_w2, ge_b2,
            g_w1, g_b1, g_w2, g_b2,
            p_w1, p_b1, p_w2, p_b2, pa_w, pa_b, p_logstd,
            v_w1, v_b1, v_w2, v_b2)


# ---------------------- pack raw params for the kernel ------------------------
def pack_params(raw):
    (se_w1, se_b1, se_w2, se_b2, ge_w1, ge_b1, ge_w2, ge_b2,
     g_w1, g_b1, g_w2, g_b2, p_w1, p_b1, p_w2, p_b2, pa_w, pa_b, p_logstd,
     v_w1, v_b1, v_w2, v_b2) = raw

    # fused layer 1: [24, 384] -> h1 = [s_e | g_e | value | p0 | p1 | p2]
    w1 = jnp.zeros((FEAT_DIM, L1_OUT), jnp.float32)
    w1 = w1.at[:STATE_DIM, 0:H].set(se_w1)
    w1 = w1.at[STATE_DIM:, H:2 * H].set(ge_w1)
    w1 = w1.at[:, 2 * H:3 * H].set(v_w1)
    for i in range(NUM_PRIMITIVES):
        w1 = w1.at[:STATE_DIM, ENC_OUT + i * PH:ENC_OUT + (i + 1) * PH].set(p_w1[i])
    b1 = jnp.concatenate([se_b1, ge_b1, v_b1, p_b1[0], p_b1[1], p_b1[2]], -1)

    # fused layer 2: single block-diagonal [384, 384]
    w2 = jnp.zeros((L1_OUT, L1_OUT), jnp.float32)
    w2 = w2.at[0:H, 0:H].set(se_w2)
    w2 = w2.at[H:2 * H, H:2 * H].set(ge_w2)
    w2 = w2.at[2 * H:3 * H, 2 * H:3 * H].set(v_w2)
    for i in range(NUM_PRIMITIVES):
        lo = ENC_OUT + i * PH
        w2 = w2.at[lo:lo + PH, lo:lo + PH].set(p_w2[i])
    b2 = jnp.concatenate([se_b2, ge_b2, v_b2, p_b2[0], p_b2[1], p_b2[2]], -1)

    # fused layer 3: [384, 128] = gate hidden (cols 0:64, rows 0:128 = g_w1,
    # value/primitive rows zero) | action heads (cols 64:88, block-diag) | pad
    w3 = jnp.zeros((L1_OUT, W3_OUT), jnp.float32)
    w3 = w3.at[:2 * H, 0:H].set(g_w1)
    for i in range(NUM_PRIMITIVES):
        w3 = w3.at[ENC_OUT + i * PH:ENC_OUT + (i + 1) * PH,
                   H + i * ACTION_DIM:H + (i + 1) * ACTION_DIM].set(pa_w[i])
    b3 = jnp.zeros((1, W3_OUT), jnp.float32)
    b3 = b3.at[:, 0:H].set(g_b1)
    for i in range(NUM_PRIMITIVES):
        b3 = b3.at[:, H + i * ACTION_DIM:H + (i + 1) * ACTION_DIM].set(pa_b[i])

    # misc slab [16, 384]: biases + block inv-sigma + transposed gate-out weight
    misc = jnp.zeros((MISC_ROWS, L1_OUT), jnp.float32)
    misc = misc.at[0:1, :].set(b1)
    misc = misc.at[1:2, :].set(b2)
    misc = misc.at[2:3, :W3_OUT].set(b3)
    misc = misc.at[3:4, :NUM_PRIMITIVES].set(g_b2)
    inv_sig = jnp.exp(-p_logstd[:, 0, :])                       # [P, A]
    for i in range(NUM_PRIMITIVES):                             # block layout
        misc = misc.at[4 + i, i * ACTION_DIM:(i + 1) * ACTION_DIM].set(inv_sig[i])
    misc = misc.at[8:8 + NUM_PRIMITIVES, :H].set(g_w2.T)        # [3, 64]

    return (w1, w2, w3, misc)


# ------------------------- pure-JAX reference --------------------------------
def mcp_reference(features, params):
    (se_w1, se_b1, se_w2, se_b2, ge_w1, ge_b1, ge_w2, ge_b2,
     g_w1, g_b1, g_w2, g_b2, p_w1, p_b1, p_w2, p_b2, pa_w, pa_b, p_logstd,
     v_w1, v_b1, v_w2, v_b2) = params
    relu = lambda x: jnp.maximum(x, 0.0)
    state, goal = features[:, :STATE_DIM], features[:, STATE_DIM:]
    s_e = relu(relu(state @ se_w1 + se_b1) @ se_w2 + se_b2)
    g_e = relu(relu(goal @ ge_w1 + ge_b1) @ ge_w2 + ge_b2)
    embed = jnp.concatenate([s_e, g_e], -1)
    w = jax.nn.sigmoid(relu(embed @ g_w1 + g_b1) @ g_w2 + g_b2)   # [B, P]
    mus, sigmas = [], []
    for i in range(NUM_PRIMITIVES):
        h = relu(relu(state @ p_w1[i] + p_b1[i]) @ p_w2[i] + p_b2[i])
        mu = h @ pa_w[i] + pa_b[i]
        mus.append(mu)
        sigmas.append(jnp.ones_like(mu) * jnp.exp(p_logstd[i]))
    mus = jnp.stack(mus, 1); sigmas = jnp.stack(sigmas, 1)
    ww = w[..., None]
    denom = (ww / sigmas).sum(-2)
    mean = (ww / sigmas * mus).sum(-2) / denom
    scale = 1.0 / denom
    value = relu(relu(features @ v_w1 + v_b1) @ v_w2 + v_b2)
    return mean, scale, value


# --------------------------------- main ---------------------------------------
if __name__ == "__main__":
    key = jax.random.PRNGKey(0)
    k_feat, k_param = jax.random.split(key)
    features = jax.random.normal(k_feat, (BATCH, FEAT_DIM), jnp.float32)
    raw_params = init_params(k_param)
    packed_params = pack_params(raw_params)

    mean, value = jax.block_until_ready(mcp_forward(features, packed_params))
    ref_mean, ref_scale, ref_value = mcp_reference(features, raw_params)

    assert mean.shape == (BATCH, ACTION_DIM)
    assert value.shape == (BATCH, VH)
    assert jnp.allclose(mean, ref_mean, atol=1e-4, rtol=1e-4)
    assert jnp.allclose(value, ref_value, atol=1e-4, rtol=1e-4)

    # learn_log_std=False branch: actor returns (mean, scale_tril diag)
    (mean2, scale2), value2 = jax.block_until_ready(
        mcp_forward(features, packed_params, learn_log_std=False))
    assert scale2.shape == (BATCH, ACTION_DIM)
    assert jnp.allclose(mean2, ref_mean, atol=1e-4, rtol=1e-4)
    assert jnp.allclose(scale2, ref_scale, atol=1e-4, rtol=1e-4)
    assert jnp.allclose(value2, ref_value, atol=1e-4, rtol=1e-4)

    print("KERNEL_OK")
</pallas_src>

<mosaic_0001>
module attributes {stable_mosaic.version = 11 : i64} {
  func.func @mcp_kernel(%arg0: i32, %arg1: memref<8x24xf32, #tpu.memory_space<vmem>>, %arg2: memref<24x384xf32, #tpu.memory_space<vmem>>, %arg3: memref<384x384xf32, #tpu.memory_space<vmem>>, %arg4: memref<384x128xf32, #tpu.memory_space<vmem>>, %arg5: memref<16x384xf32, #tpu.memory_space<vmem>>, %arg6: memref<8x128xf32, #tpu.memory_space<vmem>>) attributes {dimension_semantics = [#tpu.dimension_semantics<parallel>], iteration_bounds = array<i64: 2>, scalar_prefetch = 0 : i64, scratch_operands = 0 : i64, tpu.core_type = #tpu.core_type<tc>, window_params = [{transform_indices = @transform_0, window_bounds = array<i64: 8, 24>}, {pipeline_mode = #tpu.pipeline_mode<synchronous>, transform_indices = @transform_1, window_bounds = array<i64: 24, 384>}, {pipeline_mode = #tpu.pipeline_mode<synchronous>, transform_indices = @transform_2, window_bounds = array<i64: 384, 384>}, {pipeline_mode = #tpu.pipeline_mode<synchronous>, transform_indices = @transform_3, window_bounds = array<i64: 384, 128>}, {pipeline_mode = #tpu.pipeline_mode<synchronous>, transform_indices = @transform_4, window_bounds = array<i64: 16, 384>}, {transform_indices = @transform_5, window_bounds = array<i64: 8, 128>}]} {
    %c0 = arith.constant 0 : index
    %c0_0 = arith.constant 0 : index
    %0 = vector.load %arg1[%c0, %c0_0] : memref<8x24xf32, #tpu.memory_space<vmem>>, vector<8x24xf32>
    %c0_1 = arith.constant 0 : index
    %c0_2 = arith.constant 0 : index
    %1 = vector.load %arg5[%c0_1, %c0_2] : memref<16x384xf32, #tpu.memory_space<vmem>>, vector<16x384xf32>
    %2 = vector.extract_strided_slice %1 {offsets = [0, 0], sizes = [1, 384], strides = [1, 1]} : vector<16x384xf32> to vector<1x384xf32>
    %3 = vector.extract_strided_slice %1 {offsets = [1, 0], sizes = [1, 384], strides = [1, 1]} : vector<16x384xf32> to vector<1x384xf32>
    %4 = vector.extract_strided_slice %1 {offsets = [2, 0], sizes = [1, 128], strides = [1, 1]} : vector<16x384xf32> to vector<1x128xf32>
    %5 = vector.extract_strided_slice %1 {offsets = [3, 0], sizes = [1, 3], strides = [1, 1]} : vector<16x384xf32> to vector<1x3xf32>
    %6 = vector.extract_strided_slice %1 {offsets = [4, 0], sizes = [3, 24], strides = [1, 1]} : vector<16x384xf32> to vector<3x24xf32>
    %7 = vector.extract_strided_slice %1 {offsets = [8, 0], sizes = [3, 64], strides = [1, 1]} : vector<16x384xf32> to vector<3x64xf32>
    %c0_3 = arith.constant 0 : index
    %c0_4 = arith.constant 0 : index
    %8 = vector.load %arg2[%c0_3, %c0_4] : memref<24x384xf32, #tpu.memory_space<vmem>>, vector<24x384xf32>
    %cst = arith.constant dense<0.000000e+00> : vector<8x384xf32>
    %9 = tpu.matmul %0, %8, %cst {dimension_numbers = #tpu.dot_dimension_numbers<[1], [0], [0], [1], [0, 0, 1, 1], [], []>} : vector<8x24xf32>, vector<24x384xf32>, vector<8x384xf32> -> vector<8x384xf32>
    %10 = vector.broadcast %2 : vector<1x384xf32> to vector<8x384xf32>
    %11 = arith.addf %9, %10 : vector<8x384xf32>
    %cst_5 = arith.constant 0.000000e+00 : f32
    %12 = vector.broadcast %cst_5 : f32 to vector<8x384xf32>
    %13 = arith.maximumf %11, %12 : vector<8x384xf32>
    %c0_6 = arith.constant 0 : index
    %c0_7 = arith.constant 0 : index
    %14 = vector.load %arg3[%c0_6, %c0_7] : memref<384x384xf32, #tpu.memory_space<vmem>>, vector<384x384xf32>
    %cst_8 = arith.constant dense<0.000000e+00> : vector<8x384xf32>
    %15 = tpu.matmul %13, %14, %cst_8 {dimension_numbers = #tpu.dot_dimension_numbers<[1], [0], [0], [1], [0, 0, 1, 1], [], []>} : vector<8x384xf32>, vector<384x384xf32>, vector<8x384xf32> -> vector<8x384xf32>
    %16 = vector.broadcast %3 : vector<1x384xf32> to vector<8x384xf32>
    %17 = arith.addf %15, %16 : vector<8x384xf32>
    %cst_9 = arith.constant 0.000000e+00 : f32
    %18 = vector.broadcast %cst_9 : f32 to vector<8x384xf32>
    %19 = arith.maximumf %17, %18 : vector<8x384xf32>
    %c0_10 = arith.constant 0 : index
    %c0_11 = arith.constant 0 : index
    %20 = vector.load %arg4[%c0_10, %c0_11] : memref<384x128xf32, #tpu.memory_space<vmem>>, vector<384x128xf32>
    %cst_12 = arith.constant dense<0.000000e+00> : vector<8x128xf32>
    %21 = tpu.matmul %19, %20, %cst_12 {dimension_numbers = #tpu.dot_dimension_numbers<[1], [0], [0], [1], [0, 0, 1, 1], [], []>} : vector<8x384xf32>, vector<384x128xf32>, vector<8x128xf32> -> vector<8x128xf32>
    %22 = vector.broadcast %4 : vector<1x128xf32> to vector<8x128xf32>
    %23 = arith.addf %21, %22 : vector<8x128xf32>
    %24 = vector.extract_strided_slice %23 {offsets = [0, 0], sizes = [8, 64], strides = [1, 1]} : vector<8x128xf32> to vector<8x64xf32>
    %cst_13 = arith.constant 0.000000e+00 : f32
    %25 = vector.broadcast %cst_13 : f32 to vector<8x64xf32>
    %26 = arith.maximumf %24, %25 : vector<8x64xf32>
    %27 = vector.extract_strided_slice %23 {offsets = [0, 64], sizes = [8, 24], strides = [1, 1]} : vector<8x128xf32> to vector<8x24xf32>
    %cst_14 = arith.constant dense<0.000000e+00> : vector<8x3xf32>
    %28 = tpu.matmul %26, %7, %cst_14 {dimension_numbers = #tpu.dot_dimension_numbers<[1], [1], [0], [0], [0, 0, 1, 0], [], []>} : vector<8x64xf32>, vector<3x64xf32>, vector<8x3xf32> -> vector<8x3xf32>
    %29 = vector.broadcast %5 : vector<1x3xf32> to vector<8x3xf32>
    %30 = arith.addf %28, %29 : vector<8x3xf32>
    %31 = arith.negf %30 : vector<8x3xf32>
    %32 = math.exp %31 : vector<8x3xf32>
    %cst_15 = arith.constant 1.000000e+00 : f32
    %33 = vector.broadcast %cst_15 : f32 to vector<8x3xf32>
    %34 = arith.addf %33, %32 : vector<8x3xf32>
    %35 = arith.divf %33, %34 : vector<8x3xf32>
    %cst_16 = arith.constant dense<0.000000e+00> : vector<8x24xf32>
    %36 = tpu.matmul %35, %6, %cst_16 {dimension_numbers = #tpu.dot_dimension_numbers<[1], [0], [0], [1], [0, 0, 1, 1], [], []>} : vector<8x3xf32>, vector<3x24xf32>, vector<8x24xf32> -> vector<8x24xf32>
    %37 = vector.extract_strided_slice %36 {offsets = [0, 0], sizes = [8, 8], strides = [1, 1]} : vector<8x24xf32> to vector<8x8xf32>
    %38 = vector.extract_strided_slice %36 {offsets = [0, 8], sizes = [8, 8], strides = [1, 1]} : vector<8x24xf32> to vector<8x8xf32>
    %39 = arith.addf %37, %38 : vector<8x8xf32>
    %40 = vector.extract_strided_slice %36 {offsets = [0, 16], sizes = [8, 8], strides = [1, 1]} : vector<8x24xf32> to vector<8x8xf32>
    %41 = arith.addf %39, %40 : vector<8x8xf32>
    %42 = arith.mulf %36, %27 : vector<8x24xf32>
    %43 = vector.extract_strided_slice %42 {offsets = [0, 0], sizes = [8, 8], strides = [1, 1]} : vector<8x24xf32> to vector<8x8xf32>
    %44 = vector.extract_strided_slice %42 {offsets = [0, 8], sizes = [8, 8], strides = [1, 1]} : vector<8x24xf32> to vector<8x8xf32>
    %45 = arith.addf %43, %44 : vector<8x8xf32>
    %46 = vector.extract_strided_slice %42 {offsets = [0, 16], sizes = [8, 8], strides = [1, 1]} : vector<8x24xf32> to vector<8x8xf32>
    %47 = arith.addf %45, %46 : vector<8x8xf32>
    %48 = tpu.reciprocal %41 : vector<8x8xf32> -> vector<8x8xf32>
    %49 = arith.mulf %47, %48 : vector<8x8xf32>
    %50 = vector.extract_strided_slice %19 {offsets = [0, 128], sizes = [8, 64], strides = [1, 1]} : vector<8x384xf32> to vector<8x64xf32>
    %c0_17 = arith.constant 0 : index
    %c0_18 = arith.constant 0 : index
    %51 = vector.load %arg6[%c0_17, %c0_18] : memref<8x128xf32, #tpu.memory_space<vmem>>, vector<8x64xf32>
    tpu.vector_store %arg6[%c0_17, %c0_18], %50 {strides = array<i32>} : memref<8x128xf32, #tpu.memory_space<vmem>>, vector<8x64xf32>,
    %c0_19 = arith.constant 0 : index
    %c64 = arith.constant 64 : index
    %52 = vector.load %arg6[%c0_19, %c64] : memref<8x128xf32, #tpu.memory_space<vmem>>, vector<8x8xf32>
    tpu.vector_store %arg6[%c0_19, %c64], %49 {strides = array<i32>} : memref<8x128xf32, #tpu.memory_space<vmem>>, vector<8x8xf32>,
    %c0_20 = arith.constant 0 : index
    %c72 = arith.constant 72 : index
    %53 = vector.load %arg6[%c0_20, %c72] : memref<8x128xf32, #tpu.memory_space<vmem>>, vector<8x8xf32>
    tpu.vector_store %arg6[%c0_20, %c72], %48 {strides = array<i32>} : memref<8x128xf32, #tpu.memory_space<vmem>>, vector<8x8xf32>,
    %cst_21 = arith.constant 0.000000e+00 : f32
    %54 = vector.broadcast %cst_21 : f32 to vector<8x48xf32>
    %c0_22 = arith.constant 0 : index
    %c80 = arith.constant 80 : index
    %55 = vector.load %arg6[%c0_22, %c80] : memref<8x128xf32, #tpu.memory_space<vmem>>, vector<8x48xf32>
    tpu.vector_store %arg6[%c0_22, %c80], %54 {strides = array<i32>} : memref<8x128xf32, #tpu.memory_space<vmem>>, vector<8x48xf32>,
    return
  }
  func.func @transform_0(%arg0: i32) -> (i32, i32) {
    %c0_i32 = arith.constant 0 : i32
    %c0_i32_0 = arith.constant 0 : i32
    return %arg0, %c0_i32 : i32, i32
  }
  func.func @transform_1(%arg0: i32) -> (i32, i32) {
    %c0_i32 = arith.constant 0 : i32
    %c0_i32_0 = arith.constant 0 : i32
    %c0_i32_1 = arith.constant 0 : i32
    return %c0_i32, %c0_i32_0 : i32, i32
  }
  func.func @transform_2(%arg0: i32) -> (i32, i32) {
    %c0_i32 = arith.constant 0 : i32
    %c0_i32_0 = arith.constant 0 : i32
    %c0_i32_1 = arith.constant 0 : i32
    return %c0_i32, %c0_i32_0 : i32, i32
  }
  func.func @transform_3(%arg0: i32) -> (i32, i32) {
    %c0_i32 = arith.constant 0 : i32
    %c0_i32_0 = arith.constant 0 : i32
    %c0_i32_1 = arith.constant 0 : i32
    return %c0_i32, %c0_i32_0 : i32, i32
  }
  func.func @transform_4(%arg0: i32) -> (i32, i32) {
    %c0_i32 = arith.constant 0 : i32
    %c0_i32_0 = arith.constant 0 : i32
    %c0_i32_1 = arith.constant 0 : i32
    return %c0_i32, %c0_i32_0 : i32, i32
  }
  func.func @transform_5(%arg0: i32) -> (i32, i32) {
    %c0_i32 = arith.constant 0 : i32
    %c0_i32_0 = arith.constant 0 : i32
    return %arg0, %c0_i32 : i32, i32
  }
}

</mosaic_0001>

<bundles_post_ra>
// kernel: tpu_custom_call.1
= control target key start
LH: loop header
LB: loop body
LE: loop exit
PB: predicated region body
PF: predicated region fallthrough
CT: control target
= control target key end

     0   :  { %10 = vsyncpa [#allocation3], 0  ;;  %s2618_s0 = inlined_call_operand.hbm [shape: f32[16,24], index: 0, kind: input, shape index: {}]   ;;  %s2619_s1 = inlined_call_operand.hbm [shape: f32[24,384], index: 1, kind: input, shape index: {}]   ;;  %s2620_s2 = inlined_call_operand.hbm [shape: f32[384,384], index: 2, kind: input, shape index: {}]   ;;  %s2621_s3 = inlined_call_operand.hbm [shape: f32[384,128], index: 3, kind: input, shape index: {}]   ;;  %s2622_s4 = inlined_call_operand.hbm [shape: f32[16,384], index: 4, kind: input, shape index: {}]   ;;  %s2623_s5 = inlined_call_operand.hbm [shape: f32[16,128], index: 5, kind: output, shape index: {}]  }
   0x1   :  { %12 = vsyncpa [#allocation3 + $0x1], 0 }
   0x2   :  { %13 = vsyncpa [#allocation6], 0 }
   0x3   :  { %14 = vsyncpa [#allocation9], 0 }
   0x4   :  { %15 = vsyncpa [#allocation4], 0 }
   0x5   :  { %17 = vsyncpa [#allocation4 + $0x1], 0  ;;  %s2250_s18 = smov 0   ;;  %s2252_s19 = smov 0  }
   0x6   :  { %s2254_s20 = smov 0   ;;  %s2256_s21 = smov 0  }
   0x7 LB: > { %s2203_s22 = smov [#allocation5]   ;;  %s2271_s24 = sadd.s32 4294967295, %s2201_s21   ;;  %s2201_s21 = sphi %s2256_s21, %s2647_s21   ;;  %s2197_s20 = sphi %s2254_s20, %s2646_s20   ;;  %s2193_s19 = sphi %s2252_s19, %s2645_s19   ;;  %s2189_s18 = sphi %s2250_s18, %s2644_s18  }
   0x8   : > { %s176_s23 = sshll.u32 %s2203_s22, 4  ;;  %p1435_p0 = scmp.ge.s32.totalorder %s2201_s21, 1  ;;  %s2276_s23 = int_to_ptr.vmem [resolvable:$true] %s176_s23 }
   0x9   : > { %p2624_p1 = scmp.eq.s32.totalorder %s2271_s24, 0  ;;  %p164_p2 = scmp.lt.s32.totalorder %s2201_s21, 3 }
   0xa   : > { %s2204_s26 = smov [#allocation8]   ;;  %s2205_s29 = smov [#allocation7]  }
   0xb   : > { %p2278_p3 = pnand %p1435_p0, %p164_p2  ;;  %s202_s27 = sshll.u32 %s2204_s26, 4  ;;  %s2291_s27 = int_to_ptr.vmem [resolvable:$true] %s202_s27 }
   0xc   : > { %s2293_s30 = sshll.u32 %s2205_s29, 4  ;;  %s1985_s8 = scalar_lea.hbm %s2619_s1, 1152  ;;  %s190_s30 = int_to_ptr.vmem [resolvable:$true] %s2293_s30 }
   0xd   : > { %s2627_s25 = scalar_select %p2278_p3, 1, 0 }
   0xe   : > { %p1901_p5 = pneg %p2278_p3  ;;  %p1986_p7 = scmp.ne.s32.totalorder %s2619_s1, %s1985_s8 }
   0xf   : > { %p1992_p11 = scmp.lt.u32.totalorder %s1985_s8, %s2619_s1 }
  0x10   : > { %p2287_p6 = pnand %p1901_p5, %p2624_p1 }
  0x12   : > { %p2303_p8 = pneg %p2287_p6 }
  0x14   : > { %p1988_p9 = pnand %p2303_p8, %p1986_p7 }
  0x16   : > { %p1989_p10 = pneg %p1988_p9 }
  0x18   : > { %p1994_p12 = pnand %p1992_p11, %p1989_p10 }
  0x1a   : > { %1997 = shalt.err (!%p1994_p12)
}
  0x1b   : > { %s1998_s14 = scalar_lea.vmem %s2276_s23, 1152  ;;  %p2006_p5 = scmp.lt.s32.totalorder %s2276_s23, %s2276_s23 }
  0x1c   : > { %p1999_p13 = scmp.ne.s32.totalorder %s2276_s23, %s1998_s14  ;;  %p2007_p4 = scmp.lt.s32.totalorder %s1998_s14, %s1998_s14 }
  0x1e   : > { %p2001_p0 = pnand %p1999_p13, %p2303_p8  ;;  %p2008_p7 = por %p2007_p4, %p2006_p5 }
  0x20   : > { %p2002_p2 = pneg %p2001_p0 }
  0x22   : > { %p2009_p9 = pnand %p2008_p7, %p2002_p2 }
  0x24   : > { %2012 = shalt.err (!%p2009_p9)
}
  0x25   : > { %s2206_s15 = smov 384   ;;  %s2207_s16 = smov 24  }
  0x26   : > { %1904 = dma.hbm_to_vmem [thread:$0]  (!%p2287_p6), %s2619_s1, 1152, %s2276_s23, [#allocation6], %s2206_s15, %s2206_s15, %s2207_s16  }
  0x27   : > { %s2013_s6 = scalar_lea.hbm %s2621_s3, 6144 }
  0x28   : > { %p2014_p4 = scmp.ne.s32.totalorder %s2621_s3, %s2013_s6  ;;  %p2020_p12 = scmp.lt.u32.totalorder %s2013_s6, %s2621_s3 }
  0x2a   : > { %p2016_p10 = pnand %p2014_p4, %p2303_p8 }
  0x2c   : > { %p2017_p11 = pneg %p2016_p10 }
  0x2e   : > { %p2022_p13 = pnand %p2020_p12, %p2017_p11 }
  0x30   : > { %2025 = shalt.err (!%p2022_p13)
}
  0x31   : > { %s2026_s23 = scalar_lea.vmem %s2291_s27, 6144  ;;  %p2034_p7 = scmp.lt.s32.totalorder %s2291_s27, %s2291_s27 }
  0x32   : > { %p2027_p0 = scmp.ne.s32.totalorder %s2291_s27, %s2026_s23  ;;  %p2035_p9 = scmp.lt.s32.totalorder %s2026_s23, %s2026_s23 }
  0x34   : > { %p2029_p2 = pnand %p2027_p0, %p2303_p8  ;;  %p2036_p4 = por %p2035_p9, %p2034_p7 }
  0x36   : > { %p2030_p5 = pneg %p2029_p2 }
  0x38   : > { %p2037_p10 = pnand %p2036_p4, %p2030_p5 }
  0x3a   : > { %2040 = shalt.err (!%p2037_p10)
}
  0x3b   : > { %s2208_s12 = smov 128   ;;  %s2209_s13 = smov 8  }
  0x3c   : > { %1910 = dma.hbm_to_vmem [thread:$0]  (!%p2287_p6), %s2621_s3, 6144, %s2291_s27, [#allocation9], %s2208_s12, %s2208_s12, %s2209_s13  }
  0x3d   : > { %s2041_s29 = scalar_lea.hbm %s2620_s2, 18432 }
  0x3e   : > { %p2042_p11 = scmp.ne.s32.totalorder %s2620_s2, %s2041_s29  ;;  %p2048_p0 = scmp.lt.u32.totalorder %s2041_s29, %s2620_s2 }
  0x40   : > { %p2044_p12 = pnand %p2042_p11, %p2303_p8 }
  0x42   : > { %p2045_p13 = pneg %p2044_p12 }
  0x44   : > { %p2050_p2 = pnand %p2048_p0, %p2045_p13 }
  0x46   : > { %2053 = shalt.err (!%p2050_p2)
}
  0x47   : > { %s2054_s10 = scalar_lea.vmem %s190_s30, 18432  ;;  %p2062_p4 = scmp.lt.s32.totalorder %s190_s30, %s190_s30 }
  0x48   : > { %p2055_p5 = scmp.ne.s32.totalorder %s190_s30, %s2054_s10  ;;  %p2063_p10 = scmp.lt.s32.totalorder %s2054_s10, %s2054_s10 }
  0x4a   : > { %p2057_p7 = pnand %p2055_p5, %p2303_p8  ;;  %p2064_p1 = por %p2063_p10, %p2062_p4 }
  0x4c   : > { %p2058_p9 = pneg %p2057_p7 }
  0x4e   : > { %p2065_p3 = pnand %p2064_p1, %p2058_p9 }
  0x50   : > { %2068 = shalt.err (!%p2065_p3)
}
  0x51   : > { %1907 = dma.hbm_to_vmem [thread:$0]  (!%p2287_p6), %s2620_s2, 18432, %s190_s30, [#allocation6], %s2206_s15, %s2206_s15, %s2207_s16  }
  0x52   : > { %s2210_s12 = smov [#allocation10]   ;;  %s2069_s22 = scalar_lea.hbm %s2622_s4, 768 }
  0x53   : > { %s215_s13 = sshll.u32 %s2210_s12, 4  ;;  %p2070_p1 = scmp.ne.s32.totalorder %s2622_s4, %s2069_s22  ;;  %s216_s13 = int_to_ptr.vmem [resolvable:$true] %s215_s13 }
  0x54   : > { %p2076_p12 = scmp.lt.u32.totalorder %s2069_s22, %s2622_s4 }
  0x55   : > { %p2072_p3 = pnand %p2070_p1, %p2303_p8 }
  0x57   : > { %p2073_p11 = pneg %p2072_p3 }
  0x59   : > { %p2078_p13 = pnand %p2076_p12, %p2073_p11 }
  0x5b   : > { %2081 = shalt.err (!%p2078_p13)
}
  0x5c   : > { %s2082_s30 = scalar_lea.vmem %s216_s13, 768  ;;  %p2090_p7 = scmp.lt.s32.totalorder %s216_s13, %s216_s13 }
  0x5d   : > { %p2083_p0 = scmp.ne.s32.totalorder %s216_s13, %s2082_s30  ;;  %p2091_p9 = scmp.lt.s32.totalorder %s2082_s30, %s2082_s30 }
  0x5f   : > { %p2085_p2 = pnand %p2083_p0, %p2303_p8  ;;  %p2092_p4 = por %p2091_p9, %p2090_p7 }
  0x61   : > { %p2086_p5 = pneg %p2085_p2 }
  0x63   : > { %p2093_p10 = pnand %p2092_p4, %p2086_p5 }
  0x65   : > { %2096 = shalt.err (!%p2093_p10)
}
  0x66   : > { %1913 = dma.hbm_to_vmem [thread:$0]  (!%p2287_p6), %s2622_s4, 768, %s216_s13, [#allocation9], %s2206_s15, %s2206_s15, %s2207_s16  }
  0x67   : > { %s1434_s28 = sadd.s32 4294967294, %s2201_s21   ;;  %s2395_s11 = sadd.s32 1, %s2201_s21  }
  0x68   : > { %s27_s10 = ssub.s32 %s2201_s21, %s2395_s11  ;;  %s30_s27 = sadd.s32 1, %s2197_s20 }
  0x69   : > { %p28_p8 = scmp.eq.s32.totalorder %s27_s10, 0  ;;  %p37_p1 = scmp.ne.s32.totalorder %s2197_s20, %s2193_s19 }
  0x6a   : > { %p38_p3 = scmp.eq.s32.totalorder %s2201_s21, 0  ;;  %p43_p11 = scmp.ne.s32.totalorder %s2193_s19, %s2189_s18 }
  0x6b   : > { %s2406_s23 = scalar_select %p28_p8, %s2197_s20, %s30_s27  }
  0x6c   : > { %p2408_p12 = por %p38_p3, %p37_p1  ;;  %p2631_p13 = scmp.eq.s32.totalorder %s2271_s24, 0 }
  0x6d   : > { %p151_p0 = scmp.eq.s32.totalorder %s2271_s24, 1  ;;  %p157_p2 = scmp.eq.s32.totalorder %s1434_s28, 1 }
  0x6e   : > { %p2414_p6 = por %p2631_p13, %p43_p11  ;;  %p1926_p5 = scmp.lt.s32.totalorder %s2201_s21, 2 }
  0x6f   : > { %s229_s16 = sand.u32 1, %s2197_s20   ;;  %p2421_p7 = por %p151_p0, %p37_p1 }
  0x70   : > { %p2425_p9 = por %p157_p2, %p43_p11  ;;  %s1441_s17 = sshll.u32 %s229_s16, 3 }
  0x71   : > { %s2633_s13 = scalar_select %p2421_p7, 1, 0 }
  0x72   : > { %s2634_s14 = scalar_select %p2425_p9, 1, 0 }
  0x73   : > { %s1442_s22 = sshll.u32 %s2201_s21, 7  ;;  %s233_s7 = scalar_lea.vmem [#allocation2], %s1441_s17 }
  0x74   : > { %s2433_s6 = scalar_lea.hbm %s2618_s0, %s1442_s22  ;;  %s240_s30 = sshll.u32 %s233_s7, 4  ;;  %s2435_s30 = int_to_ptr.vmem [resolvable:$true] %s240_s30 }
  0x75   : > { %p2439_p4 = pnand %p1926_p5, %p2408_p12  ;;  %s230_s9 = scalar_lea.sflag [#allocation3], %s229_s16 }
  0x76   : > { %s2097_s28 = scalar_lea.hbm %s2433_s6, 128  ;;  %s2102_s17 = scalar_lea.hbm %s2618_s0, 256 }
  0x77   : > { %p2098_p10 = scmp.ne.s32.totalorder %s2433_s6, %s2097_s28  ;;  %p2099_p8 = pneg %p2439_p4 }
  0x78   : > { %p2103_p11 = scmp.lt.u32.totalorder %s2433_s6, %s2618_s0  ;;  %p2104_p12 = scmp.lt.u32.totalorder %s2102_s17, %s2097_s28 }
  0x79   : > { %p2100_p1 = pnand %p2099_p8, %p2098_p10  ;;  %p2106_p0 = scmp.lt.u32.totalorder %s2097_s28, %s2433_s6 }
  0x7a   : > { %p2105_p13 = por %p2104_p12, %p2103_p11 }
  0x7b   : > { %p2101_p3 = pneg %p2100_p1 }
  0x7c   : > { %p2107_p2 = por %p2106_p0, %p2105_p13 }
  0x7e   : > { %p2108_p5 = pnand %p2107_p2, %p2101_p3 }
  0x80   : > { %2111 = shalt.err (!%p2108_p5)
}
  0x81   : > { %s2112_s16 = scalar_lea.vmem %s2435_s30, 128  ;;  %s2211_s26 = smov [#allocation2]  }
  0x82   : > { %p2113_p10 = scmp.ne.s32.totalorder %s2435_s30, %s2112_s16  ;;  %s2117_s29 = sshll.u32 %s2211_s26, 4  ;;  %s2118_s29 = int_to_ptr.vmem [resolvable:$false] %s2117_s29 }
  0x83   : > { %s2119_s7 = scalar_lea.vmem %s2118_s29, 256  ;;  %p2120_p7 = scmp.lt.s32.totalorder %s2435_s30, %s2118_s29 }
  0x84   : > { %p2115_p1 = pnand %p2113_p10, %p2099_p8  ;;  %p2121_p11 = scmp.lt.s32.totalorder %s2119_s7, %s2112_s16 }
  0x86   : > { %p2116_p9 = pneg %p2115_p1  ;;  %p2122_p12 = por %p2121_p11, %p2120_p7 }
  0x88   : > { %p2123_p13 = pnand %p2122_p12, %p2116_p9 }
  0x8a   : > { %2126 = shalt.err (!%p2123_p13)
}
  0x8b   : > { %1917 = dma.hbm_to_vmem [thread:$0]  (!%p2439_p4), %s2433_s6, 128, %s2435_s30, %s230_s9  }
  0x8c   : > { %p2636_p3 = scmp.ne.s32.totalorder %s2627_s25, 0 }
  0x8d   : > { %s2471_s28 = sand.u32 (!%p2636_p3), 1, %s2193_s19  }
  0x8e   : > { %249 = sbr.rel (%p2636_p3) target bundleno = 1569 (0x621), region = 40  ;;  %s1444_s10 = sshll.u32 (!%p2636_p3), %s2471_s28, 3 }
  0x8f   : > { %s252_s27 = scalar_lea.sflag (!%p2636_p3), [#allocation3], %s2471_s28  ;;  %s2477_s17 = scalar_lea.vmem (!%p2636_p3), [#allocation2], %s1444_s10 }
  0x95   : > { %2172 = dma.done.wait (%p2414_p6), %s252_s27, 128  }
  0x96   : > { %2174 = vsyncadd (%p2414_p6), %s252_s27, 4294967168  ;;  %p2637_p7 = scmp.eq.s32.totalorder %s2271_s24, 0 }
  0x98   : > { %2176 = dma.done.wait (%p2637_p7), [#allocation6], 19584   ;;  %p2638_p9 = pmov %p2637_p7 }
  0x99   : > { %p2639_p4 = pmov %p2637_p7 }
  0x9a   : > { %2178 = vsyncadd (%p2638_p9), [#allocation6], 4294947712 }
  0x9b   : > { %2180 = dma.done.wait (%p2639_p4), [#allocation9], 6912   ;;  %p2640_p8 = pmov %p2639_p4 }
  0x9c   : > { %v2212_v0 = vmov 0.0   ;;  %v304_v1 = vld [vmem:[#allocation5 + $0x8] sm:$0xff]  ;;  %v307_v2 = vld [vmem:[#allocation5 + $0x20] sm:$0xff]  ;;  %v306_v5 = vld [vmem:[#allocation5 + $0x18] sm:$0xff]  ;;  %vm324_vm0 = vcmask 195584   ;;  %v2213_v30 = vmov 0.0|0.0  }
  0x9d   : > { %2182 = vsyncadd (%p2640_p8), [#allocation9], 4294960384  ;;  %392 = vmatprep.mubr.f32.mxu1 %v2212_v0  ;;  %v303_v3 = vld [vmem:[#allocation5] sm:$0xff]  ;;  %v1662_v4 = vpack.c.bf16 %v307_v2, %v304_v1  ;;  %v310_v7 = vld [vmem:[#allocation5 + $0x38] sm:$0xff]  ;;  %vm2214_vm1 = vmmov 0   ;;  %vm1110_vm2 = vcmask 523264  }
  0x9e   : > { %v1664_v6 = vpack.c.bf16 %v306_v5, %v303_v3  ;;  %v305_v8 = vld [vmem:[#allocation5 + $0x10] sm:$0xff]  ;;  %v308_v10 = vld [vmem:[#allocation5 + $0x28] sm:$0xff]  ;;  %v475_v15 = vld [vmem:[#allocation7 + $0x18] sm:$0xff]  ;;  %s2547_s25 = scalar_lea.vmem [#allocation11], %s1444_s10  ;;  %s2215_s15 = smov 64   ;;  %vm1199_vm3 = vcmask 1042432  }
  0x9f   : > { %1663 = vmatprep.subr.bf16.mxu1 %v1662_v4  ;;  %v309_v9 = vld [vmem:[#allocation5 + $0x30] sm:$0xff]  ;;  %v476_v12 = vld [vmem:[#allocation7 + $0x20] sm:$0xff]  ;;  %v479_v16 = vld [vmem:[#allocation7 + $0x38] sm:$0xff]  ;;  %v1667_v22 = vpack.c.bf16 %v308_v10, %v305_v8  ;;  %vm1195_vm4 = vcmask 23552   ;;  %s2216_s6 = smov 112   ;;  %s2217_s30 = smov 120  }
  0xa0   : > { %v473_v11 = vld [vmem:[#allocation7 + $0x8] sm:$0xff]  ;;  %1665 = vmatpush1.bf16.msra.mxu1 %v1664_v6  ;;  %v472_v14 = vld [vmem:[#allocation7] sm:$0xff]  ;;  %v482_v18 = vld [vmem:[#allocation7 + $0x50] sm:$0xff]  ;;  %s2218_s8 = smov 72   ;;  %vm1302_vm5 = vcmask 589312   ;;  %s1458_s9 = sshll.u32 %s2271_s24, 7 }
  0xa1   : > { %v1669_v13 = vpack.c.bf16 %v476_v12, %v473_v11  ;;  %332 = vmatprep.subr.mxu1 %v310_v7  ;;  %v1671_v17 = vpack.c.bf16 %v475_v15, %v472_v14  ;;  %v478_v19 = vld [vmem:[#allocation7 + $0x30] sm:$0xff]  ;;  %v481_v20 = vld [vmem:[#allocation7 + $0x48] sm:$0xff]  ;;  %v1673_v23 = vpack.c.bf16 %v482_v18, %v479_v16  ;;  %v488_v25 = vld [vmem:[#allocation7 + $0x80] sm:$0xff]  ;;  %s1326_s12 = sshll.u32 %s2547_s25, 4  ;;  %vm1308_vm6 = vcmask 654912   ;;  %s2571_s26 = scalar_lea.hbm %s2623_s5, %s1458_s9  ;;  %s2573_s12 = int_to_ptr.vmem [resolvable:$true] %s1326_s12 }
  0xa2   : > { %v298_v21 = vld [vmem:[%s2477_s17] sm:$0xff]  ;;  %v1675_v26 = vpack.c.bf16 %v481_v20, %v478_v19  ;;  %v484_v28 = vld [vmem:[#allocation7 + $0x60] sm:$0xff]  ;;  %v487_v29 = vld [vmem:[#allocation7 + $0x78] sm:$0xff]  ;;  %vm1310_vm7 = vcmask 1048192   ;;  %s1313_s24 = scalar_lea.sflag [#allocation4], %s2471_s28  ;;  %s2127_s29 = scalar_lea.vmem %s2573_s12, 128 }
  0xa3   : > { %1670 = vmatprep.subr.bf16.mxu0 %v1669_v13  ;;  %v485_v24 = vld [vmem:[#allocation7 + $0x68] sm:$0xff]  ;;  %v491_v31 = vld [vmem:[#allocation7 + $0x98] sm:$0xff]  ;;  %v494_v32 = vld [vmem:[#allocation7 + $0xb0] sm:$0xff]  ;;  %v1679_v34 = vpack.c.bf16 %v487_v29, %v484_v28  ;;  %p2128_p6 = scmp.ne.s32.totalorder %s2573_s12, %s2127_s29  ;;  %p2641_p0 = scmp.ne.s32.totalorder %s2633_s13, 0 }
  0xa4   : > { %1672 = vmatpush1.bf16.msra.mxu0 %v1671_v17  ;;  %333 = vmatpush1.msra.mxu1 %v309_v9  ;;  %v1677_v27 = vpack.c.bf16 %v488_v25, %v485_v24  ;;  %v311_v33 = vld [vmem:[#allocation5 + $0x40] sm:$0xff]  ;;  %v1681_v35 = vpack.c.bf16 %v494_v32, %v491_v31  ;;  %v490_v36 = vld [vmem:[#allocation7 + $0x90] sm:$0xff]  ;;  %v493_v37 = vld [vmem:[#allocation7 + $0xa8] sm:$0xff]  ;;  %s2219_s7 = smov [#allocation11]  }
  0xa5   : > { %1674 = vmatprep.subr.bf16.mxu0 %v1673_v23  ;;  %1450 = vmatmul.mubr.msk.f32.vlgmr.msra.gmra.mrb[0].mxu1 %vm324_vm0, %v298_v21  ;;  %v497_v38 = vld [vmem:[#allocation7 + $0xc8] sm:$0xff]  ;;  %v500_v39 = vld [vmem:[#allocation7 + $0xe0] sm:$0xff]  ;;  %v522_v40 = vld [vmem:[#allocation7 + $0x190] sm:$0xff]  ;;  %v1683_v41 = vpack.c.bf16 %v493_v37, %v490_v36  ;;  %p2129_p2 = pnand %p2128_p6, %p2641_p0  ;;  %s2131_s10 = sshll.u32 %s2219_s7, 4  ;;  %s2132_s10 = int_to_ptr.vmem [resolvable:$false] %s2131_s10 }
  0xa6   : > { %1666 = vmatprep.subr.bf16.mxu1 %v2213_v30  ;;  %1579 = vmatprep.mubr.msk.f32.mxu1 %vm2214_vm1, %v2212_v0  ;;  %v496_v42 = vld [vmem:[#allocation7 + $0xc0] sm:$0xff]  ;;  %v499_v43 = vld [vmem:[#allocation7 + $0xd8] sm:$0xff]  ;;  %v525_v44 = vld [vmem:[#allocation7 + $0x1a8] sm:$0xff]  ;;  %v1685_v45 = vpack.c.bf16 %v500_v39, %v497_v38  ;;  %s2133_s27 = scalar_lea.vmem %s2132_s10, 256  ;;  %p2134_p10 = scmp.lt.s32.totalorder %s2573_s12, %s2132_s10 }
  0xa7   : > { %1668 = vmatpush3.bf16.msra.mxu1 %v1667_v22  ;;  %v503_v46 = vld [vmem:[#allocation7 + $0xf8] sm:$0xff]  ;;  %v1765_v47 = vpack.c.bf16 %v525_v44, %v522_v40  ;;  %v474_v48 = vld [vmem:[#allocation7 + $0x10] sm:$0xff]  ;;  %v477_v49 = vld [vmem:[#allocation7 + $0x28] sm:$0xff]  ;;  %v1687_v56 = vpack.c.bf16 %v499_v43, %v496_v42  ;;  %p2130_p5 = pneg %p2129_p2  ;;  %p2135_p1 = scmp.lt.s32.totalorder %s2133_s27, %s2127_s29 }
  0xa8   : > { %1577 = vmatprep.subr.mxu1 %v2212_v0  ;;  %1676 = vmatpush1.bf16.msra.mxu0 %v1675_v26  ;;  %v506_v50 = vld [vmem:[#allocation7 + $0x110] sm:$0xff]  ;;  %v1767_v51 = vpack.c.bf16 %v477_v49, %v474_v48  ;;  %v528_v52 = vld [vmem:[#allocation7 + $0x1c0] sm:$0xff]  ;;  %v531_v53 = vld [vmem:[#allocation7 + $0x1d8] sm:$0xff] }
  0xa9   : > { %1678 = vmatprep.subr.bf16.mxu0 %v1677_v27  ;;  %v1769_v54 = vpack.c.bf16 %v531_v53, %v528_v52  ;;  %v480_v55 = vld [vmem:[#allocation7 + $0x40] sm:$0xff]  ;;  %v502_v57 = vld [vmem:[#allocation7 + $0xf0] sm:$0xff]  ;;  %v505_v58 = vld [vmem:[#allocation7 + $0x108] sm:$0xff]  ;;  %v1689_v60 = vpack.c.bf16 %v506_v50, %v503_v46  ;;  %p2136_p11 = por %p2135_p1, %p2134_p10 }
  0xaa   : > { %v483_v59 = vld [vmem:[#allocation7 + $0x58] sm:$0xff]  ;;  %v509_v61 = vld [vmem:[#allocation7 + $0x128] sm:$0xff]  ;;  %v534_v63 = vld [vmem:[#allocation7 + $0x1f0] sm:$0xff]  ;;  %v1691_v7 = vpack.c.bf16 %v505_v58, %v502_v57 }
  0xab   : > { %1578 = vmatpush3.msra.mxu1 %v311_v33  ;;  %v1771_v62 = vpack.c.bf16 %v483_v59, %v480_v55  ;;  %v537_v1 = vld [vmem:[#allocation7 + $0x208] sm:$0xff]  ;;  %v512_v2 = vld [vmem:[#allocation7 + $0x140] sm:$0xff]  ;;  %v486_v4 = vld [vmem:[#allocation7 + $0x70] sm:$0xff]  ;;  %p2137_p12 = pnand %p2136_p11, %p2130_p5 }
  0xac   : > { %1580 = vmatmul.mubr.msk.f32.vlgmr.msra.gmra.mrb[2].mxu1 %vm324_vm0, %v298_v21  ;;  %1680 = vmatpush1.bf16.msra.mxu0 %v1679_v34  ;;  %v1773_v3 = vpack.c.bf16 %v537_v1, %v534_v63  ;;  %v489_v5 = vld [vmem:[#allocation7 + $0x88] sm:$0xff]  ;;  %v540_v6 = vld [vmem:[#allocation7 + $0x220] sm:$0xff]  ;;  %v511_v9 = vld [vmem:[#allocation7 + $0x138] sm:$0xff]  ;;  %v1693_v12 = vpack.c.bf16 %v512_v2, %v509_v61 }
  0xad   : > { %1682 = vmatprep.subr.bf16.mxu0 %v1681_v35  ;;  %1766 = vmatprep.subr.bf16.mxu1 %v1765_v47  ;;  %v508_v8 = vld [vmem:[#allocation7 + $0x120] sm:$0xff]  ;;  %v1775_v10 = vpack.c.bf16 %v489_v5, %v486_v4  ;;  %v543_v11 = vld [vmem:[#allocation7 + $0x238] sm:$0xff]  ;;  %v518_v17 = vld [vmem:[#allocation7 + $0x170] sm:$0xff] }
  0xae   : > { %1768 = vmatpush3.bf16.msra.mxu1 %v1767_v51  ;;  %v515_v13 = vld [vmem:[#allocation7 + $0x158] sm:$0xff]  ;;  %v1777_v14 = vpack.c.bf16 %v543_v11, %v540_v6  ;;  %v492_v15 = vld [vmem:[#allocation7 + $0xa0] sm:$0xff]  ;;  %v546_v18 = vld [vmem:[#allocation7 + $0x250] sm:$0xff]  ;;  %v1695_v20 = vpack.c.bf16 %v511_v9, %v508_v8 }
  0xaf   : > { %1770 = vmatprep.subr.bf16.mxu1 %v1769_v54  ;;  %v495_v16 = vld [vmem:[#allocation7 + $0xb8] sm:$0xff]  ;;  %v549_v19 = vld [vmem:[#allocation7 + $0x268] sm:$0xff]  ;;  %v514_v21 = vld [vmem:[#allocation7 + $0x150] sm:$0xff]  ;;  %v1697_v24 = vpack.c.bf16 %v518_v17, %v515_v13 }
  0xb0   : > { %1684 = vmatpush1.bf16.msra.mxu0 %v1683_v41  ;;  %v517_v22 = vld [vmem:[#allocation7 + $0x168] sm:$0xff]  ;;  %v1779_v23 = vpack.c.bf16 %v495_v16, %v492_v15  ;;  %v1781_v26 = vpack.c.bf16 %v549_v19, %v546_v18  ;;  %v498_v27 = vld [vmem:[#allocation7 + $0xd0] sm:$0xff]  ;;  %v524_v29 = vld [vmem:[#allocation7 + $0x1a0] sm:$0xff] }
  0xb1   : > { %1686 = vmatprep.subr.bf16.mxu0 %v1685_v45  ;;  %v521_v25 = vld [vmem:[#allocation7 + $0x188] sm:$0xff]  ;;  %v552_v31 = vld [vmem:[#allocation7 + $0x280] sm:$0xff]  ;;  %v555_v32 = vld [vmem:[#allocation7 + $0x298] sm:$0xff]  ;;  %v1699_v33 = vpack.c.bf16 %v517_v22, %v514_v21 }
  0xb2   : > { %1772 = vmatpush3.bf16.msra.mxu1 %v1771_v62  ;;  %v501_v28 = vld [vmem:[#allocation7 + $0xe8] sm:$0xff]  ;;  %v520_v34 = vld [vmem:[#allocation7 + $0x180] sm:$0xff]  ;;  %v523_v35 = vld [vmem:[#allocation7 + $0x198] sm:$0xff]  ;;  %v1701_v37 = vpack.c.bf16 %v524_v29, %v521_v25  ;;  %v1785_v39 = vpack.c.bf16 %v555_v32, %v552_v31 }
  0xb3   : > { %1774 = vmatprep.subr.bf16.mxu1 %v1773_v3  ;;  %v1783_v36 = vpack.c.bf16 %v501_v28, %v498_v27  ;;  %v527_v38 = vld [vmem:[#allocation7 + $0x1b8] sm:$0xff]  ;;  %v504_v40 = vld [vmem:[#allocation7 + $0x100] sm:$0xff]  ;;  %v530_v42 = vld [vmem:[#allocation7 + $0x1d0] sm:$0xff]  ;;  %v1703_v45 = vpack.c.bf16 %v523_v35, %v520_v34 }
  0xb4   : > { %1688 = vmatpush1.bf16.msra.mxu0 %v1687_v56  ;;  %v507_v41 = vld [vmem:[#allocation7 + $0x118] sm:$0xff]  ;;  %v558_v43 = vld [vmem:[#allocation7 + $0x2b0] sm:$0xff]  ;;  %v561_v44 = vld [vmem:[#allocation7 + $0x2c8] sm:$0xff]  ;;  %v1705_v48 = vpack.c.bf16 %v530_v42, %v527_v38  ;;  %v312_v38 = vlaneseq }
  0xb5   : > { %1690 = vmatprep.subr.bf16.mxu0 %v1689_v60  ;;  %v526_v46 = vld [vmem:[#allocation7 + $0x1b0] sm:$0xff]  ;;  %v1787_v47 = vpack.c.bf16 %v507_v41, %v504_v40  ;;  %v529_v49 = vld [vmem:[#allocation7 + $0x1c8] sm:$0xff]  ;;  %v1789_v50 = vpack.c.bf16 %v561_v44, %v558_v43  ;;  %v536_v54 = vld [vmem:[#allocation7 + $0x200] sm:$0xff] }
  0xb6   : > { %1776 = vmatpush3.bf16.msra.mxu1 %v1775_v10  ;;  %v510_v51 = vld [vmem:[#allocation7 + $0x130] sm:$0xff]  ;;  %v513_v52 = vld [vmem:[#allocation7 + $0x148] sm:$0xff]  ;;  %v1707_v55 = vpack.c.bf16 %v529_v49, %v526_v46  ;;  %v532_v58 = vld [vmem:[#allocation7 + $0x1e0] sm:$0xff] }
  0xb7   : > { %1778 = vmatprep.subr.bf16.mxu1 %v1777_v14  ;;  %v533_v53 = vld [vmem:[#allocation7 + $0x1e8] sm:$0xff]  ;;  %v1791_v56 = vpack.c.bf16 %v513_v52, %v510_v51  ;;  %v535_v59 = vld [vmem:[#allocation7 + $0x1f8] sm:$0xff]  ;;  %v542_v61 = vld [vmem:[#allocation7 + $0x230] sm:$0xff] }
  0xb8   : > { %1692 = vmatpush1.bf16.msra.mxu0 %v1691_v7  ;;  %v1709_v57 = vpack.c.bf16 %v536_v54, %v533_v53  ;;  %v539_v60 = vld [vmem:[#allocation7 + $0x218] sm:$0xff]  ;;  %v1711_v62 = vpack.c.bf16 %v535_v59, %v532_v58  ;;  %v538_v1 = vld [vmem:[#allocation7 + $0x210] sm:$0xff]  ;;  %v541_v2 = vld [vmem:[#allocation7 + $0x228] sm:$0xff] }
  0xb9   : > { %1694 = vmatprep.subr.bf16.mxu0 %v1693_v12  ;;  %v1713_v63 = vpack.c.bf16 %v542_v61, %v539_v60  ;;  %v545_v3 = vld [vmem:[#allocation7 + $0x248] sm:$0xff]  ;;  %v548_v4 = vld [vmem:[#allocation7 + $0x260] sm:$0xff]  ;;  %v1715_v5 = vpack.c.bf16 %v541_v2, %v538_v1  ;;  %v547_v8 = vld [vmem:[#allocation7 + $0x258] sm:$0xff] }
  0xba   : > { %1780 = vmatpush3.bf16.msra.mxu1 %v1779_v23  ;;  %v1717_v6 = vpack.c.bf16 %v548_v4, %v545_v3  ;;  %v544_v7 = vld [vmem:[#allocation7 + $0x240] sm:$0xff]  ;;  %v551_v9 = vld [vmem:[#allocation7 + $0x278] sm:$0xff]  ;;  %v554_v10 = vld [vmem:[#allocation7 + $0x290] sm:$0xff] }
  0xbb   : > { %1782 = vmatprep.subr.bf16.mxu1 %v1781_v26  ;;  %v1719_v11 = vpack.c.bf16 %v547_v8, %v544_v7  ;;  %v1721_v12 = vpack.c.bf16 %v554_v10, %v551_v9  ;;  %v550_v13 = vld [vmem:[#allocation7 + $0x270] sm:$0xff]  ;;  %v553_v14 = vld [vmem:[#allocation7 + $0x288] sm:$0xff]  ;;  %v560_v16 = vld [vmem:[#allocation7 + $0x2c0] sm:$0xff] }
  0xbc   : > { %1696 = vmatpush1.bf16.msra.mxu0 %v1695_v20  ;;  %v557_v15 = vld [vmem:[#allocation7 + $0x2a8] sm:$0xff]  ;;  %v1723_v17 = vpack.c.bf16 %v553_v14, %v550_v13  ;;  %v556_v19 = vld [vmem:[#allocation7 + $0x2a0] sm:$0xff]  ;;  %v559_v20 = vld [vmem:[#allocation7 + $0x2b8] sm:$0xff] }
  0xbd   : > { %1698 = vmatprep.subr.bf16.mxu0 %v1697_v24  ;;  %v1725_v18 = vpack.c.bf16 %v560_v16, %v557_v15  ;;  %v1727_v21 = vpack.c.bf16 %v559_v20, %v556_v19  ;;  %v563_v22 = vld [vmem:[#allocation7 + $0x2d8] sm:$0xff]  ;;  %v566_v23 = vld [vmem:[#allocation7 + $0x2f0] sm:$0xff]  ;;  %v564_v25 = vld [vmem:[#allocation7 + $0x2e0] sm:$0xff] }
  0xbe   : > { %1784 = vmatpush3.bf16.msra.mxu1 %v1783_v36  ;;  %v1729_v24 = vpack.c.bf16 %v566_v23, %v563_v22  ;;  %v567_v26 = vld [vmem:[#allocation7 + $0x2f8] sm:$0xff]  ;;  %v562_v27 = vld [vmem:[#allocation7 + $0x2d0] sm:$0xff]  ;;  %v565_v29 = vld [vmem:[#allocation7 + $0x2e8] sm:$0xff] }
  0xbf   : > { %1786 = vmatprep.subr.bf16.mxu1 %v1785_v39  ;;  %v1793_v28 = vpack.c.bf16 %v567_v26, %v564_v25  ;;  %v516_v31 = vld [vmem:[#allocation7 + $0x160] sm:$0xff]  ;;  %v519_v32 = vld [vmem:[#allocation7 + $0x178] sm:$0xff]  ;;  %v569_v35 = vld [vmem:[#allocation7 + $0x308] sm:$0xff]  ;;  %v2500_v39 = vshrl.u32 %v312_v38, 7 }
  0xc0   : > { %1700 = vmatpush1.bf16.msra.mxu0 %v1699_v33  ;;  %v1731_v33 = vpack.c.bf16 %v565_v29, %v562_v27  ;;  %v1795_v34 = vpack.c.bf16 %v519_v32, %v516_v31  ;;  %v572_v36 = vld [vmem:[#allocation7 + $0x320] sm:$0xff]  ;;  %v2507_v42 = vld [vmem:[#allocation10 + $0x8] sm:$0xff]  ;;  %v571_v49 = vld [vmem:[#allocation7 + $0x318] sm:$0xff] }
  0xc1   : > { %1702 = vmatprep.subr.bf16.mxu0 %v1701_v37  ;;  %v1733_v37 = vpack.c.bf16 %v572_v36, %v569_v35  ;;  %v2503_v40 = vsub.s32 0, %v2500_v39  ;;  %v2505_v41 = vld [vmem:[#allocation10] sm:$0xff]  ;;  %v573_v51 = vld [vmem:[#allocation7 + $0x328] sm:$0xff]  ;;  %v575_v53 = vld [vmem:[#allocation7 + $0x338] sm:$0xff] }
  0xc2   : > { %1788 = vmatpush3.bf16.msra.mxu1 %v1787_v47  ;;  %v568_v46 = vld [vmem:[#allocation7 + $0x300] sm:$0xff]  ;;  %v578_v54 = vld [vmem:[#allocation7 + $0x350] sm:$0xff]  ;;  %v577_v61 = vld [vmem:[#allocation7 + $0x348] sm:$0xff] }
  0xc3   : > { %1790 = vmatprep.subr.bf16.mxu1 %v1789_v50  ;;  %v315_v43 = vrot.slane %v2505_v41, %v2503_v40  ;;  %v319_v44 = vrot.slane %v2507_v42, %v2503_v40  ;;  %v570_v50 = vld [vmem:[#allocation7 + $0x310] sm:$0xff]  ;;  %v1737_v60 = vpack.c.bf16 %v578_v54, %v575_v53  ;;  %v581_v1 = vld [vmem:[#allocation7 + $0x368] sm:$0xff]  ;;  %v584_v2 = vld [vmem:[#allocation7 + $0x380] sm:$0xff] }
  0xc4   : > { %1704 = vmatpush1.bf16.msra.mxu0 %v1703_v45  ;;  %v574_v58 = vld [vmem:[#allocation7 + $0x330] sm:$0xff]  ;;  %v580_v7 = vld [vmem:[#allocation7 + $0x360] sm:$0xff]  ;;  %v1741_v8 = vpack.c.bf16 %v584_v2, %v581_v1  ;;  %v583_v9 = vld [vmem:[#allocation7 + $0x378] sm:$0xff] }
  0xc5   : > { %1706 = vmatprep.subr.bf16.mxu0 %v1705_v48  ;;  %v582_v10 = vld [vmem:[#allocation7 + $0x370] sm:$0xff]  ;;  %v1743_v14 = vpack.c.bf16 %v583_v9, %v580_v7  ;;  %v588_v19 = vld [vmem:[#allocation7 + $0x3a0] sm:$0xff]  ;;  %v591_v20 = vld [vmem:[#allocation7 + $0x3b8] sm:$0xff] }
  0xc6   : > { %1792 = vmatpush3.bf16.msra.mxu1 %v1791_v56  ;;  %v1735_v56 = vpack.c.bf16 %v571_v49, %v568_v46  ;;  %v590_v13 = vld [vmem:[#allocation7 + $0x3b0] sm:$0xff]  ;;  %v596_v22 = vld [vmem:[#allocation7 + $0x3e0] sm:$0xff]  ;;  %v595_v27 = vld [vmem:[#allocation7 + $0x3d8] sm:$0xff] }
  0xc7   : > { %1794 = vmatprep.subr.bf16.mxu1 %v1793_v28  ;;  %v586_v16 = vld [vmem:[#allocation7 + $0x390] sm:$0xff]  ;;  %v592_v25 = vld [vmem:[#allocation7 + $0x3c0] sm:$0xff]  ;;  %v597_v29 = vld [vmem:[#allocation7 + $0x3e8] sm:$0xff] }
  0xc8   : > { %1708 = vmatpush1.bf16.msra.mxu0 %v1707_v55  ;;  %v594_v28 = vld [vmem:[#allocation7 + $0x3d0] sm:$0xff]  ;;  %v599_v31 = vld [vmem:[#allocation7 + $0x3f8] sm:$0xff]  ;;  %v600_v38 = vld [vmem:[#allocation7 + $0x400] sm:$0xff] }
  0xc9   : > { %1710 = vmatprep.subr.bf16.mxu0 %v1709_v57  ;;  %v1798_v57 = vpack.c.bf16 %v573_v51, %v570_v50  ;;  %v602_v32 = vld [vmem:[#allocation7 + $0x410] sm:$0xff]  ;;  %v607_v51 = vld [vmem:[#allocation7 + $0x438] sm:$0xff]  ;;  %v609_v53 = vld [vmem:[#allocation7 + $0x448] sm:$0xff] }
  0xca   : > { %1796 = vmatpush3.bf16.msra.mxu1 %v1795_v34  ;;  %v1810_v34 = vpack.c.bf16 %v597_v29, %v594_v28  ;;  %v598_v35 = vld [vmem:[#allocation7 + $0x3f0] sm:$0xff]  ;;  %v1753_v36 = vpack.c.bf16 %v602_v32, %v599_v31  ;;  %v611_v54 = vld [vmem:[#allocation7 + $0x458] sm:$0xff]  ;;  %v913_v9 = vld [vmem:[#allocation8] sm:$0xff] }
  0xcb   : > { %1797 = vmatprep.subr.bf16.mxu1 %v2213_v30  ;;  %v2522_v49 = vld [vmem:[#allocation10 + $0x10] sm:$0xff]  ;;  %v918_v28 = vld [vmem:[#allocation8 + $0x28] sm:$0xff]  ;;  %v936_v32 = vld [vmem:[#allocation8 + $0xb8] sm:$0xff] }
  0xcc   : > { %1712 = vmatpush1.bf16.msra.mxu0 %v1711_v62  ;;  %v576_v62 = vld [vmem:[#allocation7 + $0x340] sm:$0xff]  ;;  %v935_v31 = vld [vmem:[#allocation8 + $0xb0] sm:$0xff] }
  0xcd   : > { %1714 = vmatprep.subr.bf16.mxu0 %v1713_v63  ;;  %v579_v63 = vld [vmem:[#allocation7 + $0x358] sm:$0xff] }
  0xd0   : > { %1716 = vmatpush1.bf16.msra.mxu0 %v1715_v5  ;;  %v1739_v5 = vpack.c.bf16 %v577_v61, %v574_v58  ;;  %v613_v61 = vld [vmem:[#allocation7 + $0x468] sm:$0xff] }
  0xd1   : > { %1718 = vmatprep.subr.bf16.mxu0 %v1717_v6  ;;  %v1801_v6 = vpack.c.bf16 %v579_v63, %v576_v62  ;;  %v612_v62 = vld [vmem:[#allocation7 + $0x460] sm:$0xff]  ;;  %v615_v63 = vld [vmem:[#allocation7 + $0x478] sm:$0xff] }
  0xd4   : > { %1720 = vmatpush1.bf16.msra.mxu0 %v1719_v11  ;;  %v585_v11 = vld [vmem:[#allocation7 + $0x388] sm:$0xff] }
  0xd5   : > { %1722 = vmatprep.subr.bf16.mxu0 %v1721_v12  ;;  %v587_v12 = vld [vmem:[#allocation7 + $0x398] sm:$0xff]  ;;  %v1804_v15 = vpack.c.bf16 %v585_v11, %v582_v10  ;;  %v914_v10 = vld [vmem:[#allocation8 + $0x8] sm:$0xff] }
  0xd8   : > { %1724 = vmatpush1.bf16.msra.mxu0 %v1723_v17  ;;  %v1745_v17 = vpack.c.bf16 %v590_v13, %v587_v12  ;;  %v1823_v12 = vpack.c.bf16 %v914_v10, %v913_v9  ;;  %v947_v13 = vld [vmem:[#allocation8 + $0x110] sm:$0xff]  ;;  %v960_v10 = vld [vmem:[#allocation8 + $0x178] sm:$0xff] }
  0xd9   : > { %1726 = vmatprep.subr.bf16.mxu0 %v1725_v18  ;;  %v589_v18 = vld [vmem:[#allocation7 + $0x3a8] sm:$0xff]  ;;  %v959_v9 = vld [vmem:[#allocation8 + $0x170] sm:$0xff] }
  0xda   : > { %v1747_v23 = vpack.c.bf16 %v589_v18, %v586_v16  ;;  %v915_v18 = vld [vmem:[#allocation8 + $0x10] sm:$0xff] }
  0xdc   : > { %1728 = vmatpush1.bf16.msra.mxu0 %v1727_v21  ;;  %v593_v21 = vld [vmem:[#allocation7 + $0x3c8] sm:$0xff] }
  0xdd   : > { %1730 = vmatprep.subr.bf16.mxu0 %v1729_v24  ;;  %v1807_v24 = vpack.c.bf16 %v591_v20, %v588_v19  ;;  %v1749_v26 = vpack.c.bf16 %v596_v22, %v593_v21  ;;  %v916_v19 = vld [vmem:[#allocation8 + $0x18] sm:$0xff]  ;;  %v949_v21 = vld [vmem:[#allocation8 + $0x120] sm:$0xff]  ;;  %v950_v22 = vld [vmem:[#allocation8 + $0x128] sm:$0xff] }
  0xde   : > { %v1860_v29 = vpack.c.bf16 %v950_v22, %v949_v21 }
  0xe0   : > { %1732 = vmatpush1.bf16.msra.mxu0 %v1731_v33  ;;  %v1751_v33 = vpack.c.bf16 %v595_v27, %v592_v25  ;;  %v934_v25 = vld [vmem:[#allocation8 + $0xa8] sm:$0xff]  ;;  %v917_v27 = vld [vmem:[#allocation8 + $0x20] sm:$0xff] }
  0xe1   : > { %1734 = vmatprep.subr.bf16.mxu0 %v1733_v37  ;;  %v601_v37 = vld [vmem:[#allocation7 + $0x408] sm:$0xff] }
  0xe2   : > { %v1755_v46 = vpack.c.bf16 %v601_v37, %v598_v35  ;;  %v1831_v35 = vpack.c.bf16 %v918_v28, %v917_v27  ;;  %v919_v37 = vld [vmem:[#allocation8 + $0x30] sm:$0xff] }
 0x178   : > { %v394_v45 = vpop.f32.mrb[0].mxu1 }
 0x179   : > { %v395_v47 = vadd.f32 %v394_v45, %v315_v43  ;;  %v396_v48 = vpop.f32.mrb[1].mxu1  ;;  %v603_v43 = vld [vmem:[#allocation7 + $0x418] sm:$0xff]  ;;  %v608_v45 = vld [vmem:[#allocation7 + $0x440] sm:$0xff] }
 0x17a   : > { %v397_v52 = vadd.f32 %v396_v48, %v319_v44  ;;  %v605_v44 = vld [vmem:[#allocation7 + $0x428] sm:$0xff]  ;;  %v604_v48 = vld [vmem:[#allocation7 + $0x420] sm:$0xff] }
 0x17b   : > { %v469_v59 = vmax.f32 %v395_v47, 0.0  ;;  %v1813_v47 = vpack.c.bf16 %v603_v43, %v600_v38  ;;  %v1757_v50 = vpack.c.bf16 %v608_v45, %v605_v44  ;;  %v920_v38 = vld [vmem:[#allocation8 + $0x38] sm:$0xff]  ;;  %v937_v44 = vld [vmem:[#allocation8 + $0xc0] sm:$0xff]  ;;  %v938_v45 = vld [vmem:[#allocation8 + $0xc8] sm:$0xff] }
 0x17c   : > { %v470_v55 = vmax.f32 %v397_v52, 0.0  ;;  %v606_v52 = vld [vmem:[#allocation7 + $0x430] sm:$0xff] }
 0x17d   : > { %v1816_v58 = vpack.c.bf16 %v609_v53, %v606_v52  ;;  %v922_v52 = vld [vmem:[#allocation8 + $0x48] sm:$0xff] }
 0x17e   : > { %692 = vmatprep.mubr.f32.mxu0 %v470_v55  ;;  %834 = vmatprep.mubr.f32.mxu1 %v470_v55  ;;  %v614_v55 = vld [vmem:[#allocation7 + $0x470] sm:$0xff] }
 0x17f   : > { %v2513_v3 = vpop.f32.mrb[2].mxu1  ;;  %693 = vmatmul.mubr.f32.vlgmr.msra.gmra.mrb[0].mxu0 %v469_v59  ;;  %835 = vmatmul.mubr.f32.vlgmr.msra.gmra.mrb[4].mxu1 %v469_v59  ;;  %v610_v59 = vld [vmem:[#allocation7 + $0x450] sm:$0xff] }
 0x180   : > { %v1581_v4 = vpop.f32.mrb[3].mxu1  ;;  %1736 = vmatpush1.bf16.msra.mxu0 %v1735_v56  ;;  %1799 = vmatpush3.bf16.msra.mxu1 %v1798_v57  ;;  %v323_v56 = vrot.slane %v2522_v49, %v2503_v40  ;;  %v1759_v57 = vpack.c.bf16 %v607_v51, %v604_v48  ;;  %v1763_v2 = vpack.c.bf16 %v613_v61, %v610_v59  ;;  %v921_v51 = vld [vmem:[#allocation8 + $0x40] sm:$0xff]  ;;  %v924_v61 = vld [vmem:[#allocation8 + $0x58] sm:$0xff] }
 0x181   : > { %1738 = vmatprep.subr.bf16.mxu0 %v1737_v60  ;;  %1800 = vmatprep.subr.bf16.mxu1 %v2213_v30  ;;  %v1761_v60 = vpack.c.bf16 %v614_v55, %v611_v54  ;;  %v1819_v4 = vpack.c.bf16 %v615_v63, %v612_v62  ;;  %v1835_v48 = vpack.c.bf16 %v920_v38, %v919_v37  ;;  %v939_v54 = vld [vmem:[#allocation8 + $0xd0] sm:$0xff]  ;;  %v940_v55 = vld [vmem:[#allocation8 + $0xd8] sm:$0xff]  ;;  %v941_v63 = vld [vmem:[#allocation8 + $0xe0] sm:$0xff] }
 0x182   : > { %763 = vmatprep.mubr.f32.mxu0 %v2212_v0  ;;  %1614 = vmatprep.mubr.msk.f32.mxu1 %vm2214_vm1, %v2212_v0  ;;  %v466_v1 = vadd.f32 %v2513_v3, %v323_v56  ;;  %v929_v3 = vld [vmem:[#allocation8 + $0x80] sm:$0xff]  ;;  %v955_v56 = vld [vmem:[#allocation8 + $0x150] sm:$0xff]  ;;  %v1841_v59 = vpack.c.bf16 %v940_v55, %v939_v54 }
 0x184   : > { %1740 = vmatpush1.bf16.msra.mxu0 %v1739_v5  ;;  %1802 = vmatpush3.bf16.msra.mxu1 %v1801_v6  ;;  %v471_v40 = vmax.f32 %v466_v1, 0.0  ;;  %v945_v5 = vld [vmem:[#allocation8 + $0x100] sm:$0xff]  ;;  %v946_v6 = vld [vmem:[#allocation8 + $0x108] sm:$0xff] }
 0x185   : > { %1742 = vmatprep.subr.bf16.mxu0 %v1741_v8  ;;  %1803 = vmatprep.subr.bf16.mxu1 %v2213_v30  ;;  %v1854_v7 = vpack.c.bf16 %v946_v6, %v945_v5  ;;  %v930_v8 = vld [vmem:[#allocation8 + $0x88] sm:$0xff] }
 0x186   : > { %v1821_v11 = vpack.c.bf16 %v930_v8, %v929_v3  ;;  %v942_v1 = vld [vmem:[#allocation8 + $0xe8] sm:$0xff]  ;;  %v925_v3 = vld [vmem:[#allocation8 + $0x60] sm:$0xff] }
 0x187   : > { %v1845_v5 = vpack.c.bf16 %v942_v1, %v941_v63 }
 0x188   : > { %1744 = vmatpush1.bf16.msra.mxu0 %v1743_v14  ;;  %1805 = vmatpush3.bf16.msra.mxu1 %v1804_v15  ;;  %v948_v14 = vld [vmem:[#allocation8 + $0x118] sm:$0xff]  ;;  %v931_v15 = vld [vmem:[#allocation8 + $0x90] sm:$0xff] }
 0x189   : > { %1746 = vmatprep.subr.bf16.mxu0 %v1745_v17  ;;  %1806 = vmatprep.subr.bf16.mxu1 %v2213_v30  ;;  %v1857_v16 = vpack.c.bf16 %v948_v14, %v947_v13  ;;  %v932_v17 = vld [vmem:[#allocation8 + $0x98] sm:$0xff] }
 0x18a   : > { %v1825_v20 = vpack.c.bf16 %v932_v17, %v931_v15  ;;  %v944_v13 = vld [vmem:[#allocation8 + $0xf8] sm:$0xff]  ;;  %v927_v15 = vld [vmem:[#allocation8 + $0x70] sm:$0xff] }
 0x18c   : > { %1748 = vmatpush1.bf16.msra.mxu0 %v1747_v23  ;;  %1808 = vmatpush3.bf16.msra.mxu1 %v1807_v24  ;;  %v933_v23 = vld [vmem:[#allocation8 + $0xa0] sm:$0xff]  ;;  %v1827_v24 = vpack.c.bf16 %v916_v19, %v915_v18 }
 0x18d   : > { %1750 = vmatprep.subr.bf16.mxu0 %v1749_v26  ;;  %1809 = vmatprep.subr.bf16.mxu1 %v2213_v30  ;;  %v1829_v26 = vpack.c.bf16 %v934_v25, %v933_v23 }
 0x190   : > { %1752 = vmatpush1.bf16.msra.mxu0 %v1751_v33  ;;  %1811 = vmatpush3.bf16.msra.mxu1 %v1810_v34  ;;  %v951_v33 = vld [vmem:[#allocation8 + $0x130] sm:$0xff]  ;;  %v952_v34 = vld [vmem:[#allocation8 + $0x138] sm:$0xff] }
 0x191   : > { %1754 = vmatprep.subr.bf16.mxu0 %v1753_v36  ;;  %1812 = vmatprep.subr.bf16.mxu1 %v2213_v30  ;;  %v1833_v36 = vpack.c.bf16 %v936_v32, %v935_v31  ;;  %v1863_v43 = vpack.c.bf16 %v952_v34, %v951_v33 }
 0x194   : > { %1756 = vmatpush1.bf16.msra.mxu0 %v1755_v46  ;;  %1814 = vmatpush3.bf16.msra.mxu1 %v1813_v47  ;;  %v953_v46 = vld [vmem:[#allocation8 + $0x140] sm:$0xff]  ;;  %v954_v47 = vld [vmem:[#allocation8 + $0x148] sm:$0xff] }
 0x195   : > { %1758 = vmatprep.subr.bf16.mxu0 %v1757_v50  ;;  %1815 = vmatprep.subr.bf16.mxu1 %v2213_v30  ;;  %v1837_v50 = vpack.c.bf16 %v938_v45, %v937_v44  ;;  %v1866_v53 = vpack.c.bf16 %v954_v47, %v953_v46 }
 0x198   : > { %1760 = vmatpush1.bf16.msra.mxu0 %v1759_v57  ;;  %1817 = vmatpush3.bf16.msra.mxu1 %v1816_v58  ;;  %v956_v57 = vld [vmem:[#allocation8 + $0x158] sm:$0xff]  ;;  %v1839_v58 = vpack.c.bf16 %v922_v52, %v921_v51  ;;  %v1108_v51 = vsub.s32 3, %v2500_v39 }
 0x199   : > { %1762 = vmatprep.subr.bf16.mxu0 %v1761_v60  ;;  %1818 = vmatprep.subr.bf16.mxu1 %v2213_v30  ;;  %v923_v60 = vld [vmem:[#allocation8 + $0x50] sm:$0xff]  ;;  %v1869_v62 = vpack.c.bf16 %v956_v57, %v955_v56 }
 0x19a   : > { %v1109_v52 = vrot.slane %v2505_v41, %v1108_v51 }
 0x19c   : > { %1764 = vmatpush1.bf16.msra.mxu0 %v1763_v2  ;;  %1820 = vmatpush3.bf16.msra.mxu1 %v1819_v4  ;;  %v957_v2 = vld [vmem:[#allocation8 + $0x160] sm:$0xff]  ;;  %v958_v4 = vld [vmem:[#allocation8 + $0x168] sm:$0xff] }
 0x19d   : > { %1853 = vmatprep.subr.bf16.mxu0 %v2213_v30  ;;  %1822 = vmatprep.subr.bf16.mxu1 %v1821_v11  ;;  %v1872_v6 = vpack.c.bf16 %v958_v4, %v957_v2  ;;  %v1875_v11 = vpack.c.bf16 %v960_v10, %v959_v9 }
 0x19f   : > { %764 = vmatmul.mubr.f32.vlgmr.msra.gmra.mrb[0].mxu0 %v471_v40  ;;  %1615 = vmatmul.mubr.f32.vlgmr.msra.gmra.mrb[6].mxu1 %v471_v40  ;;  %v1843_v40 = vpack.c.bf16 %v924_v61, %v923_v60 }
 0x1a0   : > { %1649 = vmatprep.mubr.msk.f32.mxu0 %vm2214_vm1, %v2212_v0  ;;  %1855 = vmatpush3.bf16.msra.mxu0 %v1854_v7  ;;  %v926_v7 = vld [vmem:[#allocation8 + $0x68] sm:$0xff] }
 0x1a1   : > { %1856 = vmatprep.subr.bf16.mxu0 %v2213_v30  ;;  %1824 = vmatpush3.bf16.msra.mxu1 %v1823_v12  ;;  %v1847_v8 = vpack.c.bf16 %v926_v7, %v925_v3  ;;  %v943_v12 = vld [vmem:[#allocation8 + $0xf0] sm:$0xff] }
 0x1a2   : > { %1826 = vmatprep.subr.bf16.mxu1 %v1825_v20  ;;  %v1849_v14 = vpack.c.bf16 %v944_v13, %v943_v12 }
 0x1a4   : > { %1858 = vmatpush3.bf16.msra.mxu0 %v1857_v16  ;;  %v928_v16 = vld [vmem:[#allocation8 + $0x78] sm:$0xff] }
 0x1a5   : > { %1859 = vmatprep.subr.bf16.mxu0 %v2213_v30  ;;  %1828 = vmatpush3.bf16.msra.mxu1 %v1827_v24  ;;  %v1851_v17 = vpack.c.bf16 %v928_v16, %v927_v15 }
 0x1a6   : > { %1830 = vmatprep.subr.bf16.mxu1 %v1829_v26 }
 0x1a8   : > { %1861 = vmatpush3.bf16.msra.mxu0 %v1860_v29 }
 0x1a9   : > { %1862 = vmatprep.subr.bf16.mxu0 %v2213_v30  ;;  %1832 = vmatpush3.bf16.msra.mxu1 %v1831_v35 }
 0x1aa   : > { %1834 = vmatprep.subr.bf16.mxu1 %v1833_v36 }
 0x1ac   : > { %1864 = vmatpush3.bf16.msra.mxu0 %v1863_v43 }
 0x1ad   : > { %1865 = vmatprep.subr.bf16.mxu0 %v2213_v30  ;;  %1836 = vmatpush3.bf16.msra.mxu1 %v1835_v48 }
 0x1ae   : > { %1838 = vmatprep.subr.bf16.mxu1 %v1837_v50  ;;  %v1194_v50 = vrot.slane %v2505_v41, 4 }
 0x1b0   : > { %1867 = vmatpush3.bf16.msra.mxu0 %v1866_v53 }
 0x1b1   : > { %1868 = vmatprep.subr.bf16.mxu0 %v2213_v30  ;;  %1840 = vmatpush3.bf16.msra.mxu1 %v1839_v58 }
 0x1b2   : > { %1842 = vmatprep.subr.bf16.mxu1 %v1841_v59 }
 0x1b4   : > { %1870 = vmatpush3.bf16.msra.mxu0 %v1869_v62 }
 0x1b5   : > { %1871 = vmatprep.subr.bf16.mxu0 %v2213_v30  ;;  %1844 = vmatpush3.bf16.msra.mxu1 %v1843_v40 }
 0x1b6   : > { %1846 = vmatprep.subr.bf16.mxu1 %v1845_v5 }
 0x1b8   : > { %1873 = vmatpush3.bf16.msra.mxu0 %v1872_v6 }
 0x1b9   : > { %1874 = vmatprep.subr.bf16.mxu0 %v2213_v30  ;;  %1848 = vmatpush3.bf16.msra.mxu1 %v1847_v8  ;;  %v618_v30 = vsub.s32 1, %v2500_v39 }
 0x1ba   : > { %1850 = vmatprep.subr.bf16.mxu1 %v1849_v14 }
 0x1bb   : > { %v627_v21 = vrot.slane %v2522_v49, %v618_v30  ;;  %v619_v22 = vrot.slane %v2505_v41, %v618_v30  ;;  %v623_v23 = vrot.slane %v2507_v42, %v618_v30  ;;  %v302_v42 = vld [vmem:[#allocation10 + $0x18] sm:$0xff]  ;;  %v963_v49 = vsub.s32 2, %v2500_v39 }
 0x1bc   : > { %1876 = vmatpush3.bf16.msra.mxu0 %v1875_v11 }
 0x1bd   : > { %1852 = vmatpush3.bf16.msra.mxu1 %v1851_v17  ;;  %v964_v43 = vrot.slane %v2505_v41, %v963_v49 }
 0x1be   : > { %1652 = vmatprep.subr.mxu1 %v2212_v0 }
 0x252   : > { %v1497_v18 = vpop.f32.mrb[4].mxu1 }
 0x253   : > { %v1498_v19 = vpop.f32.mrb[5].mxu1 }
 0x254   : > { %v1499_v20 = vadd.f32 %v1498_v19, %v1497_v18 }
 0x256   : > { %v837_v24 = vadd.f32 %v1499_v20, %v627_v21 }
 0x272   : > { %v765_v25 = vpop.f32.mrb[0].mxu0  ;;  %v906_v26 = vpop.f32.mrb[6].mxu1 }
 0x273   : > { %v1877_v27 = vadd.f32 %v765_v25, %v619_v22  ;;  %v907_v28 = vadd.f32 %v906_v26, %v837_v24  ;;  %v767_v29 = vpop.f32.mrb[1].mxu0  ;;  %v1616_v31 = vpop.f32.mrb[7].mxu1 }
 0x274   : > { %v1878_v32 = vadd.f32 %v767_v29, %v623_v23 }
 0x275   : > { %v912_v33 = vmax.f32 %v907_v28, 0.0  ;;  %v910_v35 = vmax.f32 %v1877_v27, 0.0 }
 0x276   : > { %v911_v34 = vmax.f32 %v1878_v32, 0.0 }
 0x277   : > { %1650 = vmatmul.mubr.f32.vlgmr.msra.gmra.mrb[2].mxu0 %v912_v33 }
 0x278   : > { %1029 = vmatprep.mubr.f32.mxu1 %v911_v34  ;;  %1297 = vst.msk [vmem:[%s2547_s25] sm:$0xff] %vm1110_vm2, %v911_v34 }
 0x279   : > { %1030 = vmatmul.mubr.f32.vlgmr.msra.gmra.mrb[8].mxu1 %v910_v35 }
 0x27a   : > { %1654 = vmatprep.mubr.msk.f32.mxu1 %vm2214_vm1, %v2212_v0  ;;  %1653 = vmatpush3.xpose.msk.msra.mxu1 %vm1110_vm2, %v302_v42 }
 0x27b   : > { %1657 = vmatprep.subr.mxu1 %v2212_v0 }
 0x34a   : > { %v1101_v36 = vpop.f32.mrb[2].mxu0 }
 0x34b   : > { %v1651_v37 = vpop.f32.mrb[3].mxu0 }
 0x34c   : > { %v1549_v38 = vpop.f32.mrb[8].mxu1 }
 0x34d   : > { %v1550_v44 = vpop.f32.mrb[9].mxu1 }
 0x34e   : > { %v1551_v45 = vadd.f32 %v1550_v44, %v1549_v38 }
 0x350   : > { %v1032_v46 = vadd.f32 %v1551_v45, %v964_v43 }
 0x352   : > { %v1102_v47 = vadd.f32 %v1101_v36, %v1032_v46 }
 0x354   : > { %1282 = vrot.lane.b32.xlu0 %v1102_v47, %s2215_s15  ;;  %v1105_v48 = vmax.f32 %v1102_v47, 0.0 }
 0x356   : > { %1655 = vmatmul.mubr.msk.f32.vlgmr.msra.gmra.mrb[10].mxu1 %vm1110_vm2, %v1105_v48 }
 0x357   : > { %1659 = vmatprep.mubr.msk.f32.mxu1 %vm2214_vm1, %v2212_v0  ;;  %1658 = vmatpush3.msk.msra.mxu1 %vm1199_vm3, %v1194_v50 }
 0x3c6   : > { %v1283_v39 = vpop.permute.xlu0 %1282 }
 0x429   : > { %v1183_v53 = vpop.f32.mrb[10].mxu1 }
 0x42a   : > { %v1184_v54 = vadd.f32 %v1183_v53, %v1109_v52  ;;  %v1656_v55 = vpop.f32.mrb[11].mxu1 }
 0x42c   : > { %v1454_v56 = vmul.f32 -1.442695, %v1184_v54 }
 0x42e   : > { %1979 = vpow2.f32 %v1454_v56 }
 0x438   : > { %v1980_v57 = vpop.eup %1979 }
 0x439   : > { %v1190_v58 = vadd.f32 1.0, %v1980_v57 }
 0x43b   : > { %1981 = vrcp.f32 %v1190_v58 }
 0x445   : > { %v1982_v59 = vpop.eup %1981 }
 0x446   : > { %1660 = vmatmul.mubr.msk.f32.vlgmr.msra.gmra.mrb[12].mxu1 %vm1195_vm4, %v1982_v59 }
 0x519   : > { %v1268_v60 = vpop.f32.mrb[12].mxu1 }
 0x51a   : > { %1277 = vrot.lane.b32.xlu1 %v1268_v60, %s2216_s6  ;;  %1273 = vrot.lane.b32.xlu0 %v1268_v60, %s2217_s30  ;;  %v1661_v61 = vpop.f32.mrb[13].mxu1  ;;  %v1285_v62 = vmul.f32 %v1283_v39, %v1268_v60 }
 0x51e   : > { %1291 = vrot.lane.b32.xlu0 %v1285_v62, %s2216_s6  ;;  %1287 = vrot.lane.b32.xlu1 %v1285_v62, %s2217_s30 }
 0x58c   : > { %v1274_v41 = vpop.permute.xlu0 %1273  ;;  %v1278_v63 = vpop.permute.xlu1 %1277 }
 0x58d   : > { %v1276_v1 = vadd.f32 %v1274_v41, %v1268_v60 }
 0x58f   : > { %v1280_v2 = vadd.f32 %v1278_v63, %v1276_v1 }
 0x590   : > { %v1288_v4 = vpop.permute.xlu1 %1287  ;;  %v1292_v5 = vpop.permute.xlu0 %1291 }
 0x591   : > { %1983 = vrcp.f32 %v1280_v2  ;;  %v1290_v40 = vadd.f32 %v1288_v4, %v1285_v62 }
 0x593   : > { %v1294_v6 = vadd.f32 %v1292_v5, %v1290_v40 }
 0x59b   : > { %v1984_v3 = vpop.eup %1983 }
 0x59c   : > { %1305 = vrot.lane.b32.xlu0 %v1984_v3, %s2218_s8  ;;  %v1296_v7 = vmul.f32 %v1984_v3, %v1294_v6 }
 0x59e   : > { %1299 = vrot.lane.b32.xlu1 %v1296_v7, %s2215_s15 }
 0x60e   : > { %v1306_v9 = vpop.permute.xlu0 %1305 }
 0x610   : > { %v1300_v8 = vpop.permute.xlu1 %1299 }
 0x611   : > { %1303 = vst.msk [vmem:[%s2547_s25] sm:$0xff] %vm1302_vm5, %v1300_v8 }
 0x612   : > { %1309 = vst.msk [vmem:[%s2547_s25] sm:$0xff] %vm1308_vm6, %v1306_v9 }
 0x613   : > { %1311 = vst.msk [vmem:[%s2547_s25] sm:$0xff] %vm1310_vm7, %v2212_v0 }
 0x614   : > { %2140 = shalt.err (!%p2137_p12)
}
 0x615   : > { %s2141_s28 = scalar_lea.hbm %s2571_s26, 128  ;;  %s2145_s15 = scalar_lea.hbm %s2623_s5, 256 }
 0x616   : > { %p2142_p13 = scmp.ne.s32.totalorder %s2571_s26, %s2141_s28  ;;  %p2146_p9 = scmp.lt.u32.totalorder %s2571_s26, %s2623_s5 }
 0x617   : > { %p2147_p4 = scmp.lt.u32.totalorder %s2145_s15, %s2141_s28  ;;  %p2149_p6 = scmp.lt.u32.totalorder %s2141_s28, %s2571_s26 }
 0x618   : > { %p2143_p3 = pnand %p2142_p13, %p2641_p0 }
 0x619   : > { %p2148_p8 = por %p2147_p4, %p2146_p9 }
 0x61a   : > { %p2144_p7 = pneg %p2143_p3 }
 0x61b   : > { %p2150_p2 = por %p2149_p6, %p2148_p8 }
 0x61d   : > { %p2151_p5 = pnand %p2150_p2, %p2144_p7 }
 0x61f   : > { %2154 = shalt.err (!%p2151_p5)
}
 0x620   : > { %1899 = dma.vmem_to_hbm [thread:$0]  (%p2641_p0), %s2573_s12, 128, %s2571_s26, %s1313_s24  }
 0x621 PF: > { %s1338_s8 = sand.u32 1, %s2189_s18   ;;  %p2642_p10 = scmp.ne.s32.totalorder %s2634_s14, 0 }
 0x622   : > { %p2643_p1 = scmp.ge.s32.totalorder %s2201_s21, 2  ;;  %s1339_s9 = scalar_lea.sflag [#allocation4], %s1338_s8 }
 0x624   : > { %p1919_p11 = pnand %p2643_p1, %p2642_p10 }
 0x626   : > { %2184 = dma.done.wait (!%p1919_p11), %s1339_s9, 128  }
 0x627   : > { %2186 = vsyncadd (!%p1919_p11), %s1339_s9, 4294967168  ;;  %p20_p12 = scmp.ge.s32.totalorder %s2395_s11, 4   ;;  %s2644_s18 = smov %s2193_s19 }
 0x628   : > { %s2645_s19 = smov %s2197_s20  ;;  %s2646_s20 = smov %s2406_s23 }
 0x629   : > { %s2647_s21 = smov %s2395_s11  ;;  %22 = sbr.rel (!%p20_p12) target bundleno = 7 (0x7), region = 101 }
 0x630   :  { %1344 = vsyncpa [#allocation3], 1 }
 0x631   :  { %1346 = vsyncpa [#allocation3 + $0x1], 1 }
 0x632   :  { %1347 = vsyncpa [#allocation6], 1 }
 0x633   :  { %1348 = vsyncpa [#allocation9], 1 }
 0x634   :  { %1349 = vsyncpa [#allocation4], 1 }
 0x635   :  { %1351 = vsyncpa [#allocation4 + $0x1], 1 }

</bundles_post_ra>
